<compile_context>
chip_gen: v7x
topology: tpu7x:2x2x1
jax: 0.10.0
libtpu: 0.0.40
codegen_flags: <defaults>
</compile_context>

<pallas_src>
import jax
import jax.numpy as jnp
from jax.experimental import pallas as pl
from jax.experimental.pallas import tpu as pltpu


# ----------------------------- Pallas kernel -------------------------------- #
def _bigru_last_kernel(x_ref, len_ref, wih_ref, bih_ref, whh_ref, bhh_ref,
                       out_ref, gi_scr):
    """Single invocation: full bidirectional GRU recurrence over T steps.

    x_ref   : (T*N, E) f32  time-major flattened embedded input
    len_ref : (N, 1)   i32  effective lengths, clamped to [1, max_utt_len]
    wih_ref : (E, 2*Wg) f32 input weights, cols [fwd r|z|n .. pad | bwd r|z|n .. pad]
    bih_ref : (1, 2*Wg) f32 input biases (same layout)
    whh_ref : (2H, 2*Wg) f32 block-diagonal recurrent weights (fwd / bwd blocks)
    bhh_ref : (1, 2*Wg) f32 recurrent biases
    out_ref : (N, OUTW) f32 lane-dense slab; [:, :2H] = [h_fwd_last | h_bwd_last]
    gi_scr  : (T*N, 2*Wg) f32 VMEM scratch holding all precomputed input gates
    """
    N = len_ref.shape[0]
    T = x_ref.shape[0] // N
    H = whh_ref.shape[0] // 2
    Wg = wih_ref.shape[1] // 2
    G = 3 * H

    # (1) All input projections, both directions, all timesteps: one big MXU op.
    gi_scr[...] = (
        jnp.dot(x_ref[...], wih_ref[...], preferred_element_type=jnp.float32)
        + bih_ref[...])

    # Loop-invariant loads hoisted out of the recurrence.
    w_hh = whh_ref[...]            # (2H, 2*Wg) block-diagonal
    b_hh = bhh_ref[...]            # (1, 2*Wg)
    lens = len_ref[...]            # (N, 1) int32

    def gru_update(gi, gh, h):
        # PyTorch GRU gate order r, z, n.  gi/gh: (N, 3H), h: (N, H).
        r = jax.nn.sigmoid(gi[:, 0:H] + gh[:, 0:H])
        z = jax.nn.sigmoid(gi[:, H:2 * H] + gh[:, H:2 * H])
        n = jnp.tanh(gi[:, 2 * H:G] + r * gh[:, 2 * H:G])
        return (1.0 - z) * n + z * h

    def step(t, h_cat):
        tb = T - 1 - t
        # (2) One fused recurrent matmul advances BOTH directions.
        gh_all = jnp.dot(h_cat, w_hh, preferred_element_type=jnp.float32) + b_hh

        gi_f = gi_scr[pl.ds(t * N, N), pl.ds(0, G)]     # fwd gates at pos t
        gi_b = gi_scr[pl.ds(tb * N, N), pl.ds(Wg, G)]   # bwd gates at pos T-1-t

        h_f = h_cat[:, 0:H]
        h_b = h_cat[:, H:2 * H]
        hf_new = gru_update(gi_f, gh_all[:, 0:G], h_f)
        hb_new = gru_update(gi_b, gh_all[:, Wg:Wg + G], h_b)

        # pack_padded_sequence semantics: hidden only advances while pos < len.
        hf_new = jnp.where(lens > t, hf_new, h_f)
        hb_new = jnp.where(lens > tb, hb_new, h_b)
        return jnp.concatenate([hf_new, hb_new], axis=1)

    h0 = jnp.zeros((N, 2 * H), jnp.float32)
    h_last = jax.lax.fori_loop(0, T, step, h0, unroll=True)

    out_w = out_ref.shape[1]
    if out_w > 2 * H:   # lane-dense padded output slab; wrapper slices [:, :2H]
        h_last = jnp.concatenate(
            [h_last, jnp.zeros((N, out_w - 2 * H), jnp.float32)], axis=1)
    out_ref[...] = h_last


def bigru_last_pallas(x_flat, eff_len, w_ih, b_ih, w_hh, b_hh, *, T, N, H):
    """x_flat: (T*N, E) f32 time-major.  Returns (N, OUTW) f32 padded slab."""
    two_h = 2 * H
    out_w = max(128, ((two_h + 127) // 128) * 128)
    wg = w_ih.shape[1] // 2
    lens2d = eff_len.reshape(N, 1).astype(jnp.int32)

    vmem = lambda: pl.BlockSpec(memory_space=pltpu.MemorySpace.VMEM)
    return pl.pallas_call(
        _bigru_last_kernel,
        out_shape=jax.ShapeDtypeStruct((N, out_w), jnp.float32),
        in_specs=[vmem() for _ in range(6)],
        out_specs=vmem(),
        scratch_shapes=[pltpu.VMEM((T * N, 2 * wg), jnp.float32)],
    )(x_flat, lens2d, w_ih, b_ih, w_hh, b_hh)


# ------------------------------ glue / wrapper ------------------------------- #
def _pack_gru_params(params, H, E):
    """Pack PyTorch-layout GRU params into lane-aligned fused arrays.

    Per-direction gate block width Wg = 3H rounded up to a multiple of 128 so the
    fwd/bwd column groups are vreg-aligned; W_hh is block-diagonal so one matmul
    advances both directions.
    """
    G = 3 * H
    Wg = ((G + 127) // 128) * 128

    w_ih = jnp.zeros((E, 2 * Wg), jnp.float32)
    w_ih = w_ih.at[:, 0:G].set(params['w_ih_f'].T)
    w_ih = w_ih.at[:, Wg:Wg + G].set(params['w_ih_b'].T)

    b_ih = jnp.zeros((1, 2 * Wg), jnp.float32)
    b_ih = b_ih.at[0, 0:G].set(params['b_ih_f'])
    b_ih = b_ih.at[0, Wg:Wg + G].set(params['b_ih_b'])

    w_hh = jnp.zeros((2 * H, 2 * Wg), jnp.float32)
    w_hh = w_hh.at[0:H, 0:G].set(params['w_hh_f'].T)
    w_hh = w_hh.at[H:2 * H, Wg:Wg + G].set(params['w_hh_b'].T)

    b_hh = jnp.zeros((1, 2 * Wg), jnp.float32)
    b_hh = b_hh.at[0, 0:G].set(params['b_hh_f'])
    b_hh = b_hh.at[0, Wg:Wg + G].set(params['b_hh_b'])
    return w_ih, b_ih, w_hh, b_hh


def rnn_utt_encoder_forward(params, utterances, lens):
    """Equivalent of RnnUttEncoder.forward(utterances, lens) with defaults
    (use_attn=False, feats=None, init_state=None, return_all=False)."""
    B, C, T = utterances.shape
    N = B * C
    H = params['w_hh_f'].shape[1]
    E = params['embedding'].shape[1]

    flat_words = utterances.reshape(N, T)
    words_embedded = jnp.take(params['embedding'], flat_words, axis=0)  # (N,T,E)

    flat_lens = lens.reshape(N).astype(jnp.int32)
    max_utt_len = jnp.minimum(jnp.max(flat_lens), T)
    eff_len = jnp.minimum(jnp.maximum(flat_lens, 1), max_utt_len)

    # time-major, flattened so the whole input projection is one kernel matmul
    x_flat = jnp.transpose(words_embedded, (1, 0, 2)).reshape(T * N, E)
    x_flat = x_flat.astype(jnp.float32)

    w_ih, b_ih, w_hh, b_hh = _pack_gru_params(params, H, E)

    out_pad = bigru_last_pallas(x_flat, eff_len, w_ih, b_ih, w_hh, b_hh,
                                T=T, N=N, H=H)
    return out_pad[:, :2 * H].reshape(B, C, 2 * H)


# --------------------------- pure-JAX reference ------------------------------ #
def reference_forward(params, utterances, lens):
    B, C, T = utterances.shape
    N = B * C
    H = params['w_hh_f'].shape[1]
    x = jnp.take(params['embedding'], utterances.reshape(N, T), axis=0)
    x = x.astype(jnp.float32)
    flat_lens = lens.reshape(N).astype(jnp.int32)
    max_utt_len = jnp.minimum(jnp.max(flat_lens), T)
    eff_len = jnp.minimum(jnp.maximum(flat_lens, 1), max_utt_len)

    def cell(x_t, h, w_ih, w_hh, b_ih, b_hh):
        gi = x_t @ w_ih.T + b_ih
        gh = h @ w_hh.T + b_hh
        r = jax.nn.sigmoid(gi[:, :H] + gh[:, :H])
        z = jax.nn.sigmoid(gi[:, H:2 * H] + gh[:, H:2 * H])
        n = jnp.tanh(gi[:, 2 * H:] + r * gh[:, 2 * H:])
        return (1.0 - z) * n + z * h

    def run_dir(xs, positions, w_ih, w_hh, b_ih, b_hh):
        def step(h, inp):
            x_t, pos = inp
            h_new = cell(x_t, h, w_ih, w_hh, b_ih, b_hh)
            m = (eff_len > pos)[:, None]
            return jnp.where(m, h_new, h), None
        h0 = jnp.zeros((N, H), jnp.float32)
        h_last, _ = jax.lax.scan(step, h0, (xs, positions))
        return h_last

    xs_f = jnp.transpose(x, (1, 0, 2))
    pos = jnp.arange(T)
    h_f = run_dir(xs_f, pos, params['w_ih_f'], params['w_hh_f'],
                  params['b_ih_f'], params['b_hh_f'])
    h_b = run_dir(xs_f[::-1], pos[::-1], params['w_ih_b'], params['w_hh_b'],
                  params['b_ih_b'], params['b_hh_b'])
    return jnp.concatenate([h_f, h_b], axis=-1).reshape(B, C, 2 * H)


# ----------------------------------- main ------------------------------------ #
if __name__ == "__main__":
    key = jax.random.PRNGKey(0)
    B, C, T = 2, 4, 8                       # batch, max_ctx_lens, utt_dim
    vocab_size, embed_dim, H = 50, 32, 32   # utt_cell_size = 32, bidirection=True
    ks = jax.random.split(key, 12)
    s = 0.1

    params = {
        'embedding': s * jax.random.normal(ks[0], (vocab_size, embed_dim), jnp.float32),
        'w_ih_f': s * jax.random.normal(ks[1], (3 * H, embed_dim), jnp.float32),
        'w_hh_f': s * jax.random.normal(ks[2], (3 * H, H), jnp.float32),
        'b_ih_f': s * jax.random.normal(ks[3], (3 * H,), jnp.float32),
        'b_hh_f': s * jax.random.normal(ks[4], (3 * H,), jnp.float32),
        'w_ih_b': s * jax.random.normal(ks[5], (3 * H, embed_dim), jnp.float32),
        'w_hh_b': s * jax.random.normal(ks[6], (3 * H, H), jnp.float32),
        'b_ih_b': s * jax.random.normal(ks[7], (3 * H,), jnp.float32),
        'b_hh_b': s * jax.random.normal(ks[8], (3 * H,), jnp.float32),
    }
    utterances = jax.random.randint(ks[9], (B, C, T), 0, vocab_size, dtype=jnp.int32)
    lens = jax.random.randint(ks[10], (B, C), 0, T + 1, dtype=jnp.int32)

    out = jax.jit(rnn_utt_encoder_forward)(params, utterances, lens)
    out = jax.block_until_ready(out)

    ref = reference_forward(params, utterances, lens)
    assert out.shape == (B, C, 2 * H), out.shape
    max_err = float(jnp.max(jnp.abs(out - ref)))
    assert jnp.allclose(out, ref, atol=2e-3, rtol=2e-3), f"max_err={max_err}"

    print("KERNEL_OK")
</pallas_src>

<mosaic_0001>
module attributes {stable_mosaic.version = 11 : i64} {
  func.func @_bigru_last_kernel(%arg0: memref<64x32xf32, #tpu.memory_space<vmem>>, %arg1: memref<8x1xi32, #tpu.memory_space<vmem>>, %arg2: memref<32x256xf32, #tpu.memory_space<vmem>>, %arg3: memref<1x256xf32, #tpu.memory_space<vmem>>, %arg4: memref<64x256xf32, #tpu.memory_space<vmem>>, %arg5: memref<1x256xf32, #tpu.memory_space<vmem>>, %arg6: memref<8x128xf32, #tpu.memory_space<vmem>>, %arg7: memref<64x256xf32, #tpu.memory_space<vmem>>) attributes {dimension_semantics = [], scalar_prefetch = 0 : i64, scratch_operands = 1 : i64, tpu.core_type = #tpu.core_type<tc>} {
    %c0 = arith.constant 0 : index
    %c0_0 = arith.constant 0 : index
    %0 = vector.load %arg0[%c0, %c0_0] : memref<64x32xf32, #tpu.memory_space<vmem>>, vector<64x32xf32>
    %c0_1 = arith.constant 0 : index
    %c0_2 = arith.constant 0 : index
    %1 = vector.load %arg2[%c0_1, %c0_2] : memref<32x256xf32, #tpu.memory_space<vmem>>, vector<32x256xf32>
    %cst = arith.constant dense<0.000000e+00> : vector<64x256xf32>
    %2 = tpu.matmul %0, %1, %cst {dimension_numbers = #tpu.dot_dimension_numbers<[1], [0], [0], [1], [0, 0, 1, 1], [], []>} : vector<64x32xf32>, vector<32x256xf32>, vector<64x256xf32> -> vector<64x256xf32>
    %c0_3 = arith.constant 0 : index
    %c0_4 = arith.constant 0 : index
    %3 = vector.load %arg3[%c0_3, %c0_4] : memref<1x256xf32, #tpu.memory_space<vmem>>, vector<1x256xf32>
    %4 = vector.broadcast %3 : vector<1x256xf32> to vector<64x256xf32>
    %5 = arith.addf %2, %4 : vector<64x256xf32>
    %c0_5 = arith.constant 0 : index
    %c0_6 = arith.constant 0 : index
    %6 = vector.load %arg7[%c0_5, %c0_6] : memref<64x256xf32, #tpu.memory_space<vmem>>, vector<64x256xf32>
    tpu.vector_store %arg7[%c0_5, %c0_6], %5 {strides = array<i32>} : memref<64x256xf32, #tpu.memory_space<vmem>>, vector<64x256xf32>,
    %c0_7 = arith.constant 0 : index
    %c0_8 = arith.constant 0 : index
    %7 = vector.load %arg4[%c0_7, %c0_8] : memref<64x256xf32, #tpu.memory_space<vmem>>, vector<64x256xf32>
    %c0_9 = arith.constant 0 : index
    %c0_10 = arith.constant 0 : index
    %8 = vector.load %arg5[%c0_9, %c0_10] : memref<1x256xf32, #tpu.memory_space<vmem>>, vector<1x256xf32>
    %c0_11 = arith.constant 0 : index
    %c0_12 = arith.constant 0 : index
    %9 = vector.load %arg1[%c0_11, %c0_12] : memref<8x1xi32, #tpu.memory_space<vmem>>, vector<8x1xi32>
    %cst_13 = arith.constant 0.000000e+00 : f32
    %10 = vector.broadcast %cst_13 : f32 to vector<8x64xf32>
    %c0_i32 = arith.constant 0 : i32
    %c7_i32 = arith.constant 7 : i32
    %11 = arith.subi %c7_i32, %c0_i32 : i32
    %cst_14 = arith.constant dense<0.000000e+00> : vector<8x256xf32>
    %12 = tpu.matmul %10, %7, %cst_14 {dimension_numbers = #tpu.dot_dimension_numbers<[1], [0], [0], [1], [0, 0, 1, 1], [], []>} : vector<8x64xf32>, vector<64x256xf32>, vector<8x256xf32> -> vector<8x256xf32>
    %13 = vector.broadcast %8 : vector<1x256xf32> to vector<8x256xf32>
    %14 = arith.addf %12, %13 : vector<8x256xf32>
    %c8_i32 = arith.constant 8 : i32
    %15 = arith.muli %c0_i32, %c8_i32 : i32
    %16 = arith.index_cast %15 : i32 to index
    %c0_15 = arith.constant 0 : index
    %17 = vector.load %arg7[%16, %c0_15] : memref<64x256xf32, #tpu.memory_space<vmem>>, vector<8x96xf32>
    %c8_i32_16 = arith.constant 8 : i32
    %18 = arith.muli %11, %c8_i32_16 : i32
    %19 = arith.index_cast %18 : i32 to index
    %c128 = arith.constant 128 : index
    %20 = vector.load %arg7[%19, %c128] : memref<64x256xf32, #tpu.memory_space<vmem>>, vector<8x96xf32>
    %21 = vector.extract_strided_slice %10 {offsets = [0, 0], sizes = [8, 32], strides = [1, 1]} : vector<8x64xf32> to vector<8x32xf32>
    %22 = vector.extract_strided_slice %10 {offsets = [0, 32], sizes = [8, 32], strides = [1, 1]} : vector<8x64xf32> to vector<8x32xf32>
    %23 = vector.extract_strided_slice %14 {offsets = [0, 0], sizes = [8, 96], strides = [1, 1]} : vector<8x256xf32> to vector<8x96xf32>
    %24 = vector.extract_strided_slice %17 {offsets = [0, 0], sizes = [8, 32], strides = [1, 1]} : vector<8x96xf32> to vector<8x32xf32>
    %25 = vector.extract_strided_slice %23 {offsets = [0, 0], sizes = [8, 32], strides = [1, 1]} : vector<8x96xf32> to vector<8x32xf32>
    %26 = arith.addf %24, %25 : vector<8x32xf32>
    %27 = arith.negf %26 : vector<8x32xf32>
    %28 = math.exp %27 : vector<8x32xf32>
    %cst_17 = arith.constant 1.000000e+00 : f32
    %29 = vector.broadcast %cst_17 : f32 to vector<8x32xf32>
    %30 = arith.addf %29, %28 : vector<8x32xf32>
    %31 = arith.divf %29, %30 : vector<8x32xf32>
    %32 = vector.extract_strided_slice %17 {offsets = [0, 32], sizes = [8, 32], strides = [1, 1]} : vector<8x96xf32> to vector<8x32xf32>
    %33 = vector.extract_strided_slice %23 {offsets = [0, 32], sizes = [8, 32], strides = [1, 1]} : vector<8x96xf32> to vector<8x32xf32>
    %34 = arith.addf %32, %33 : vector<8x32xf32>
    %35 = arith.negf %34 : vector<8x32xf32>
    %36 = math.exp %35 : vector<8x32xf32>
    %cst_18 = arith.constant 1.000000e+00 : f32
    %37 = vector.broadcast %cst_18 : f32 to vector<8x32xf32>
    %38 = arith.addf %37, %36 : vector<8x32xf32>
    %39 = arith.divf %37, %38 : vector<8x32xf32>
    %40 = vector.extract_strided_slice %17 {offsets = [0, 64], sizes = [8, 32], strides = [1, 1]} : vector<8x96xf32> to vector<8x32xf32>
    %41 = vector.extract_strided_slice %23 {offsets = [0, 64], sizes = [8, 32], strides = [1, 1]} : vector<8x96xf32> to vector<8x32xf32>
    %42 = arith.mulf %31, %41 : vector<8x32xf32>
    %43 = arith.addf %40, %42 : vector<8x32xf32>
    %44 = math.tanh %43 : vector<8x32xf32>
    %cst_19 = arith.constant 1.000000e+00 : f32
    %45 = vector.broadcast %cst_19 : f32 to vector<8x32xf32>
    %46 = arith.subf %45, %39 : vector<8x32xf32>
    %47 = arith.mulf %46, %44 : vector<8x32xf32>
    %48 = arith.mulf %39, %21 : vector<8x32xf32>
    %49 = arith.addf %47, %48 : vector<8x32xf32>
    %50 = vector.extract_strided_slice %14 {offsets = [0, 128], sizes = [8, 96], strides = [1, 1]} : vector<8x256xf32> to vector<8x96xf32>
    %51 = vector.extract_strided_slice %20 {offsets = [0, 0], sizes = [8, 32], strides = [1, 1]} : vector<8x96xf32> to vector<8x32xf32>
    %52 = vector.extract_strided_slice %50 {offsets = [0, 0], sizes = [8, 32], strides = [1, 1]} : vector<8x96xf32> to vector<8x32xf32>
    %53 = arith.addf %51, %52 : vector<8x32xf32>
    %54 = arith.negf %53 : vector<8x32xf32>
    %55 = math.exp %54 : vector<8x32xf32>
    %cst_20 = arith.constant 1.000000e+00 : f32
    %56 = vector.broadcast %cst_20 : f32 to vector<8x32xf32>
    %57 = arith.addf %56, %55 : vector<8x32xf32>
    %58 = arith.divf %56, %57 : vector<8x32xf32>
    %59 = vector.extract_strided_slice %20 {offsets = [0, 32], sizes = [8, 32], strides = [1, 1]} : vector<8x96xf32> to vector<8x32xf32>
    %60 = vector.extract_strided_slice %50 {offsets = [0, 32], sizes = [8, 32], strides = [1, 1]} : vector<8x96xf32> to vector<8x32xf32>
    %61 = arith.addf %59, %60 : vector<8x32xf32>
    %62 = arith.negf %61 : vector<8x32xf32>
    %63 = math.exp %62 : vector<8x32xf32>
    %cst_21 = arith.constant 1.000000e+00 : f32
    %64 = vector.broadcast %cst_21 : f32 to vector<8x32xf32>
    %65 = arith.addf %64, %63 : vector<8x32xf32>
    %66 = arith.divf %64, %65 : vector<8x32xf32>
    %67 = vector.extract_strided_slice %20 {offsets = [0, 64], sizes = [8, 32], strides = [1, 1]} : vector<8x96xf32> to vector<8x32xf32>
    %68 = vector.extract_strided_slice %50 {offsets = [0, 64], sizes = [8, 32], strides = [1, 1]} : vector<8x96xf32> to vector<8x32xf32>
    %69 = arith.mulf %58, %68 : vector<8x32xf32>
    %70 = arith.addf %67, %69 : vector<8x32xf32>
    %71 = math.tanh %70 : vector<8x32xf32>
    %cst_22 = arith.constant 1.000000e+00 : f32
    %72 = vector.broadcast %cst_22 : f32 to vector<8x32xf32>
    %73 = arith.subf %72, %66 : vector<8x32xf32>
    %74 = arith.mulf %73, %71 : vector<8x32xf32>
    %75 = arith.mulf %66, %22 : vector<8x32xf32>
    %76 = arith.addf %74, %75 : vector<8x32xf32>
    %77 = vector.broadcast %c0_i32 : i32 to vector<8x1xi32>
    %78 = arith.cmpi sgt, %9, %77 : vector<8x1xi32>
    %79 = vector.shape_cast %78 : vector<8x1xi1> to vector<8x1xi1>
    %80 = vector.broadcast %79 : vector<8x1xi1> to vector<8x32xi1>
    %81 = arith.select %80, %49, %21 : vector<8x32xi1>, vector<8x32xf32>
    %82 = vector.broadcast %11 : i32 to vector<8x1xi32>
    %83 = arith.cmpi sgt, %9, %82 : vector<8x1xi32>
    %84 = vector.shape_cast %83 : vector<8x1xi1> to vector<8x1xi1>
    %85 = vector.broadcast %84 : vector<8x1xi1> to vector<8x32xi1>
    %86 = arith.select %85, %76, %22 : vector<8x32xi1>, vector<8x32xf32>
    %87 = tpu.concatenate %81, %86 in 1 : vector<8x32xf32>, vector<8x32xf32> -> vector<8x64xf32>
    %c1_i32 = arith.constant 1 : i32
    %c7_i32_23 = arith.constant 7 : i32
    %88 = arith.subi %c7_i32_23, %c1_i32 : i32
    %cst_24 = arith.constant dense<0.000000e+00> : vector<8x256xf32>
    %89 = tpu.matmul %87, %7, %cst_24 {dimension_numbers = #tpu.dot_dimension_numbers<[1], [0], [0], [1], [0, 0, 1, 1], [], []>} : vector<8x64xf32>, vector<64x256xf32>, vector<8x256xf32> -> vector<8x256xf32>
    %90 = vector.broadcast %8 : vector<1x256xf32> to vector<8x256xf32>
    %91 = arith.addf %89, %90 : vector<8x256xf32>
    %c8_i32_25 = arith.constant 8 : i32
    %92 = arith.muli %c1_i32, %c8_i32_25 : i32
    %93 = arith.index_cast %92 : i32 to index
    %c0_26 = arith.constant 0 : index
    %94 = vector.load %arg7[%93, %c0_26] : memref<64x256xf32, #tpu.memory_space<vmem>>, vector<8x96xf32>
    %c8_i32_27 = arith.constant 8 : i32
    %95 = arith.muli %88, %c8_i32_27 : i32
    %96 = arith.index_cast %95 : i32 to index
    %c128_28 = arith.constant 128 : index
    %97 = vector.load %arg7[%96, %c128_28] : memref<64x256xf32, #tpu.memory_space<vmem>>, vector<8x96xf32>
    %98 = vector.extract_strided_slice %87 {offsets = [0, 0], sizes = [8, 32], strides = [1, 1]} : vector<8x64xf32> to vector<8x32xf32>
    %99 = vector.extract_strided_slice %87 {offsets = [0, 32], sizes = [8, 32], strides = [1, 1]} : vector<8x64xf32> to vector<8x32xf32>
    %100 = vector.extract_strided_slice %91 {offsets = [0, 0], sizes = [8, 96], strides = [1, 1]} : vector<8x256xf32> to vector<8x96xf32>
    %101 = vector.extract_strided_slice %94 {offsets = [0, 0], sizes = [8, 32], strides = [1, 1]} : vector<8x96xf32> to vector<8x32xf32>
    %102 = vector.extract_strided_slice %100 {offsets = [0, 0], sizes = [8, 32], strides = [1, 1]} : vector<8x96xf32> to vector<8x32xf32>
    %103 = arith.addf %101, %102 : vector<8x32xf32>
    %104 = arith.negf %103 : vector<8x32xf32>
    %105 = math.exp %104 : vector<8x32xf32>
    %cst_29 = arith.constant 1.000000e+00 : f32
    %106 = vector.broadcast %cst_29 : f32 to vector<8x32xf32>
    %107 = arith.addf %106, %105 : vector<8x32xf32>
    %108 = arith.divf %106, %107 : vector<8x32xf32>
    %109 = vector.extract_strided_slice %94 {offsets = [0, 32], sizes = [8, 32], strides = [1, 1]} : vector<8x96xf32> to vector<8x32xf32>
    %110 = vector.extract_strided_slice %100 {offsets = [0, 32], sizes = [8, 32], strides = [1, 1]} : vector<8x96xf32> to vector<8x32xf32>
    %111 = arith.addf %109, %110 : vector<8x32xf32>
    %112 = arith.negf %111 : vector<8x32xf32>
    %113 = math.exp %112 : vector<8x32xf32>
    %cst_30 = arith.constant 1.000000e+00 : f32
    %114 = vector.broadcast %cst_30 : f32 to vector<8x32xf32>
    %115 = arith.addf %114, %113 : vector<8x32xf32>
    %116 = arith.divf %114, %115 : vector<8x32xf32>
    %117 = vector.extract_strided_slice %94 {offsets = [0, 64], sizes = [8, 32], strides = [1, 1]} : vector<8x96xf32> to vector<8x32xf32>
    %118 = vector.extract_strided_slice %100 {offsets = [0, 64], sizes = [8, 32], strides = [1, 1]} : vector<8x96xf32> to vector<8x32xf32>
    %119 = arith.mulf %108, %118 : vector<8x32xf32>
    %120 = arith.addf %117, %119 : vector<8x32xf32>
    %121 = math.tanh %120 : vector<8x32xf32>
    %cst_31 = arith.constant 1.000000e+00 : f32
    %122 = vector.broadcast %cst_31 : f32 to vector<8x32xf32>
    %123 = arith.subf %122, %116 : vector<8x32xf32>
    %124 = arith.mulf %123, %121 : vector<8x32xf32>
    %125 = arith.mulf %116, %98 : vector<8x32xf32>
    %126 = arith.addf %124, %125 : vector<8x32xf32>
    %127 = vector.extract_strided_slice %91 {offsets = [0, 128], sizes = [8, 96], strides = [1, 1]} : vector<8x256xf32> to vector<8x96xf32>
    %128 = vector.extract_strided_slice %97 {offsets = [0, 0], sizes = [8, 32], strides = [1, 1]} : vector<8x96xf32> to vector<8x32xf32>
    %129 = vector.extract_strided_slice %127 {offsets = [0, 0], sizes = [8, 32], strides = [1, 1]} : vector<8x96xf32> to vector<8x32xf32>
    %130 = arith.addf %128, %129 : vector<8x32xf32>
    %131 = arith.negf %130 : vector<8x32xf32>
    %132 = math.exp %131 : vector<8x32xf32>
    %cst_32 = arith.constant 1.000000e+00 : f32
    %133 = vector.broadcast %cst_32 : f32 to vector<8x32xf32>
    %134 = arith.addf %133, %132 : vector<8x32xf32>
    %135 = arith.divf %133, %134 : vector<8x32xf32>
    %136 = vector.extract_strided_slice %97 {offsets = [0, 32], sizes = [8, 32], strides = [1, 1]} : vector<8x96xf32> to vector<8x32xf32>
    %137 = vector.extract_strided_slice %127 {offsets = [0, 32], sizes = [8, 32], strides = [1, 1]} : vector<8x96xf32> to vector<8x32xf32>
    %138 = arith.addf %136, %137 : vector<8x32xf32>
    %139 = arith.negf %138 : vector<8x32xf32>
    %140 = math.exp %139 : vector<8x32xf32>
    %cst_33 = arith.constant 1.000000e+00 : f32
    %141 = vector.broadcast %cst_33 : f32 to vector<8x32xf32>
    %142 = arith.addf %141, %140 : vector<8x32xf32>
    %143 = arith.divf %141, %142 : vector<8x32xf32>
    %144 = vector.extract_strided_slice %97 {offsets = [0, 64], sizes = [8, 32], strides = [1, 1]} : vector<8x96xf32> to vector<8x32xf32>
    %145 = vector.extract_strided_slice %127 {offsets = [0, 64], sizes = [8, 32], strides = [1, 1]} : vector<8x96xf32> to vector<8x32xf32>
    %146 = arith.mulf %135, %145 : vector<8x32xf32>
    %147 = arith.addf %144, %146 : vector<8x32xf32>
    %148 = math.tanh %147 : vector<8x32xf32>
    %cst_34 = arith.constant 1.000000e+00 : f32
    %149 = vector.broadcast %cst_34 : f32 to vector<8x32xf32>
    %150 = arith.subf %149, %143 : vector<8x32xf32>
    %151 = arith.mulf %150, %148 : vector<8x32xf32>
    %152 = arith.mulf %143, %99 : vector<8x32xf32>
    %153 = arith.addf %151, %152 : vector<8x32xf32>
    %154 = vector.broadcast %c1_i32 : i32 to vector<8x1xi32>
    %155 = arith.cmpi sgt, %9, %154 : vector<8x1xi32>
    %156 = vector.shape_cast %155 : vector<8x1xi1> to vector<8x1xi1>
    %157 = vector.broadcast %156 : vector<8x1xi1> to vector<8x32xi1>
    %158 = arith.select %157, %126, %98 : vector<8x32xi1>, vector<8x32xf32>
    %159 = vector.broadcast %88 : i32 to vector<8x1xi32>
    %160 = arith.cmpi sgt, %9, %159 : vector<8x1xi32>
    %161 = vector.shape_cast %160 : vector<8x1xi1> to vector<8x1xi1>
    %162 = vector.broadcast %161 : vector<8x1xi1> to vector<8x32xi1>
    %163 = arith.select %162, %153, %99 : vector<8x32xi1>, vector<8x32xf32>
    %164 = tpu.concatenate %158, %163 in 1 : vector<8x32xf32>, vector<8x32xf32> -> vector<8x64xf32>
    %c2_i32 = arith.constant 2 : i32
    %c7_i32_35 = arith.constant 7 : i32
    %165 = arith.subi %c7_i32_35, %c2_i32 : i32
    %cst_36 = arith.constant dense<0.000000e+00> : vector<8x256xf32>
    %166 = tpu.matmul %164, %7, %cst_36 {dimension_numbers = #tpu.dot_dimension_numbers<[1], [0], [0], [1], [0, 0, 1, 1], [], []>} : vector<8x64xf32>, vector<64x256xf32>, vector<8x256xf32> -> vector<8x256xf32>
    %167 = vector.broadcast %8 : vector<1x256xf32> to vector<8x256xf32>
    %168 = arith.addf %166, %167 : vector<8x256xf32>
    %c8_i32_37 = arith.constant 8 : i32
    %169 = arith.muli %c2_i32, %c8_i32_37 : i32
    %170 = arith.index_cast %169 : i32 to index
    %c0_38 = arith.constant 0 : index
    %171 = vector.load %arg7[%170, %c0_38] : memref<64x256xf32, #tpu.memory_space<vmem>>, vector<8x96xf32>
    %c8_i32_39 = arith.constant 8 : i32
    %172 = arith.muli %165, %c8_i32_39 : i32
    %173 = arith.index_cast %172 : i32 to index
    %c128_40 = arith.constant 128 : index
    %174 = vector.load %arg7[%173, %c128_40] : memref<64x256xf32, #tpu.memory_space<vmem>>, vector<8x96xf32>
    %175 = vector.extract_strided_slice %164 {offsets = [0, 0], sizes = [8, 32], strides = [1, 1]} : vector<8x64xf32> to vector<8x32xf32>
    %176 = vector.extract_strided_slice %164 {offsets = [0, 32], sizes = [8, 32], strides = [1, 1]} : vector<8x64xf32> to vector<8x32xf32>
    %177 = vector.extract_strided_slice %168 {offsets = [0, 0], sizes = [8, 96], strides = [1, 1]} : vector<8x256xf32> to vector<8x96xf32>
    %178 = vector.extract_strided_slice %171 {offsets = [0, 0], sizes = [8, 32], strides = [1, 1]} : vector<8x96xf32> to vector<8x32xf32>
    %179 = vector.extract_strided_slice %177 {offsets = [0, 0], sizes = [8, 32], strides = [1, 1]} : vector<8x96xf32> to vector<8x32xf32>
    %180 = arith.addf %178, %179 : vector<8x32xf32>
    %181 = arith.negf %180 : vector<8x32xf32>
    %182 = math.exp %181 : vector<8x32xf32>
    %cst_41 = arith.constant 1.000000e+00 : f32
    %183 = vector.broadcast %cst_41 : f32 to vector<8x32xf32>
    %184 = arith.addf %183, %182 : vector<8x32xf32>
    %185 = arith.divf %183, %184 : vector<8x32xf32>
    %186 = vector.extract_strided_slice %171 {offsets = [0, 32], sizes = [8, 32], strides = [1, 1]} : vector<8x96xf32> to vector<8x32xf32>
    %187 = vector.extract_strided_slice %177 {offsets = [0, 32], sizes = [8, 32], strides = [1, 1]} : vector<8x96xf32> to vector<8x32xf32>
    %188 = arith.addf %186, %187 : vector<8x32xf32>
    %189 = arith.negf %188 : vector<8x32xf32>
    %190 = math.exp %189 : vector<8x32xf32>
    %cst_42 = arith.constant 1.000000e+00 : f32
    %191 = vector.broadcast %cst_42 : f32 to vector<8x32xf32>
    %192 = arith.addf %191, %190 : vector<8x32xf32>
    %193 = arith.divf %191, %192 : vector<8x32xf32>
    %194 = vector.extract_strided_slice %171 {offsets = [0, 64], sizes = [8, 32], strides = [1, 1]} : vector<8x96xf32> to vector<8x32xf32>
    %195 = vector.extract_strided_slice %177 {offsets = [0, 64], sizes = [8, 32], strides = [1, 1]} : vector<8x96xf32> to vector<8x32xf32>
    %196 = arith.mulf %185, %195 : vector<8x32xf32>
    %197 = arith.addf %194, %196 : vector<8x32xf32>
    %198 = math.tanh %197 : vector<8x32xf32>
    %cst_43 = arith.constant 1.000000e+00 : f32
    %199 = vector.broadcast %cst_43 : f32 to vector<8x32xf32>
    %200 = arith.subf %199, %193 : vector<8x32xf32>
    %201 = arith.mulf %200, %198 : vector<8x32xf32>
    %202 = arith.mulf %193, %175 : vector<8x32xf32>
    %203 = arith.addf %201, %202 : vector<8x32xf32>
    %204 = vector.extract_strided_slice %168 {offsets = [0, 128], sizes = [8, 96], strides = [1, 1]} : vector<8x256xf32> to vector<8x96xf32>
    %205 = vector.extract_strided_slice %174 {offsets = [0, 0], sizes = [8, 32], strides = [1, 1]} : vector<8x96xf32> to vector<8x32xf32>
    %206 = vector.extract_strided_slice %204 {offsets = [0, 0], sizes = [8, 32], strides = [1, 1]} : vector<8x96xf32> to vector<8x32xf32>
    %207 = arith.addf %205, %206 : vector<8x32xf32>
    %208 = arith.negf %207 : vector<8x32xf32>
    %209 = math.exp %208 : vector<8x32xf32>
    %cst_44 = arith.constant 1.000000e+00 : f32
    %210 = vector.broadcast %cst_44 : f32 to vector<8x32xf32>
    %211 = arith.addf %210, %209 : vector<8x32xf32>
    %212 = arith.divf %210, %211 : vector<8x32xf32>
    %213 = vector.extract_strided_slice %174 {offsets = [0, 32], sizes = [8, 32], strides = [1, 1]} : vector<8x96xf32> to vector<8x32xf32>
    %214 = vector.extract_strided_slice %204 {offsets = [0, 32], sizes = [8, 32], strides = [1, 1]} : vector<8x96xf32> to vector<8x32xf32>
    %215 = arith.addf %213, %214 : vector<8x32xf32>
    %216 = arith.negf %215 : vector<8x32xf32>
    %217 = math.exp %216 : vector<8x32xf32>
    %cst_45 = arith.constant 1.000000e+00 : f32
    %218 = vector.broadcast %cst_45 : f32 to vector<8x32xf32>
    %219 = arith.addf %218, %217 : vector<8x32xf32>
    %220 = arith.divf %218, %219 : vector<8x32xf32>
    %221 = vector.extract_strided_slice %174 {offsets = [0, 64], sizes = [8, 32], strides = [1, 1]} : vector<8x96xf32> to vector<8x32xf32>
    %222 = vector.extract_strided_slice %204 {offsets = [0, 64], sizes = [8, 32], strides = [1, 1]} : vector<8x96xf32> to vector<8x32xf32>
    %223 = arith.mulf %212, %222 : vector<8x32xf32>
    %224 = arith.addf %221, %223 : vector<8x32xf32>
    %225 = math.tanh %224 : vector<8x32xf32>
    %cst_46 = arith.constant 1.000000e+00 : f32
    %226 = vector.broadcast %cst_46 : f32 to vector<8x32xf32>
    %227 = arith.subf %226, %220 : vector<8x32xf32>
    %228 = arith.mulf %227, %225 : vector<8x32xf32>
    %229 = arith.mulf %220, %176 : vector<8x32xf32>
    %230 = arith.addf %228, %229 : vector<8x32xf32>
    %231 = vector.broadcast %c2_i32 : i32 to vector<8x1xi32>
    %232 = arith.cmpi sgt, %9, %231 : vector<8x1xi32>
    %233 = vector.shape_cast %232 : vector<8x1xi1> to vector<8x1xi1>
    %234 = vector.broadcast %233 : vector<8x1xi1> to vector<8x32xi1>
    %235 = arith.select %234, %203, %175 : vector<8x32xi1>, vector<8x32xf32>
    %236 = vector.broadcast %165 : i32 to vector<8x1xi32>
    %237 = arith.cmpi sgt, %9, %236 : vector<8x1xi32>
    %238 = vector.shape_cast %237 : vector<8x1xi1> to vector<8x1xi1>
    %239 = vector.broadcast %238 : vector<8x1xi1> to vector<8x32xi1>
    %240 = arith.select %239, %230, %176 : vector<8x32xi1>, vector<8x32xf32>
    %241 = tpu.concatenate %235, %240 in 1 : vector<8x32xf32>, vector<8x32xf32> -> vector<8x64xf32>
    %c3_i32 = arith.constant 3 : i32
    %c7_i32_47 = arith.constant 7 : i32
    %242 = arith.subi %c7_i32_47, %c3_i32 : i32
    %cst_48 = arith.constant dense<0.000000e+00> : vector<8x256xf32>
    %243 = tpu.matmul %241, %7, %cst_48 {dimension_numbers = #tpu.dot_dimension_numbers<[1], [0], [0], [1], [0, 0, 1, 1], [], []>} : vector<8x64xf32>, vector<64x256xf32>, vector<8x256xf32> -> vector<8x256xf32>
    %244 = vector.broadcast %8 : vector<1x256xf32> to vector<8x256xf32>
    %245 = arith.addf %243, %244 : vector<8x256xf32>
    %c8_i32_49 = arith.constant 8 : i32
    %246 = arith.muli %c3_i32, %c8_i32_49 : i32
    %247 = arith.index_cast %246 : i32 to index
    %c0_50 = arith.constant 0 : index
    %248 = vector.load %arg7[%247, %c0_50] : memref<64x256xf32, #tpu.memory_space<vmem>>, vector<8x96xf32>
    %c8_i32_51 = arith.constant 8 : i32
    %249 = arith.muli %242, %c8_i32_51 : i32
    %250 = arith.index_cast %249 : i32 to index
    %c128_52 = arith.constant 128 : index
    %251 = vector.load %arg7[%250, %c128_52] : memref<64x256xf32, #tpu.memory_space<vmem>>, vector<8x96xf32>
    %252 = vector.extract_strided_slice %241 {offsets = [0, 0], sizes = [8, 32], strides = [1, 1]} : vector<8x64xf32> to vector<8x32xf32>
    %253 = vector.extract_strided_slice %241 {offsets = [0, 32], sizes = [8, 32], strides = [1, 1]} : vector<8x64xf32> to vector<8x32xf32>
    %254 = vector.extract_strided_slice %245 {offsets = [0, 0], sizes = [8, 96], strides = [1, 1]} : vector<8x256xf32> to vector<8x96xf32>
    %255 = vector.extract_strided_slice %248 {offsets = [0, 0], sizes = [8, 32], strides = [1, 1]} : vector<8x96xf32> to vector<8x32xf32>
    %256 = vector.extract_strided_slice %254 {offsets = [0, 0], sizes = [8, 32], strides = [1, 1]} : vector<8x96xf32> to vector<8x32xf32>
    %257 = arith.addf %255, %256 : vector<8x32xf32>
    %258 = arith.negf %257 : vector<8x32xf32>
    %259 = math.exp %258 : vector<8x32xf32>
    %cst_53 = arith.constant 1.000000e+00 : f32
    %260 = vector.broadcast %cst_53 : f32 to vector<8x32xf32>
    %261 = arith.addf %260, %259 : vector<8x32xf32>
    %262 = arith.divf %260, %261 : vector<8x32xf32>
    %263 = vector.extract_strided_slice %248 {offsets = [0, 32], sizes = [8, 32], strides = [1, 1]} : vector<8x96xf32> to vector<8x32xf32>
    %264 = vector.extract_strided_slice %254 {offsets = [0, 32], sizes = [8, 32], strides = [1, 1]} : vector<8x96xf32> to vector<8x32xf32>
    %265 = arith.addf %263, %264 : vector<8x32xf32>
    %266 = arith.negf %265 : vector<8x32xf32>
    %267 = math.exp %266 : vector<8x32xf32>
    %cst_54 = arith.constant 1.000000e+00 : f32
    %268 = vector.broadcast %cst_54 : f32 to vector<8x32xf32>
    %269 = arith.addf %268, %267 : vector<8x32xf32>
    %270 = arith.divf %268, %269 : vector<8x32xf32>
    %271 = vector.extract_strided_slice %248 {offsets = [0, 64], sizes = [8, 32], strides = [1, 1]} : vector<8x96xf32> to vector<8x32xf32>
    %272 = vector.extract_strided_slice %254 {offsets = [0, 64], sizes = [8, 32], strides = [1, 1]} : vector<8x96xf32> to vector<8x32xf32>
    %273 = arith.mulf %262, %272 : vector<8x32xf32>
    %274 = arith.addf %271, %273 : vector<8x32xf32>
    %275 = math.tanh %274 : vector<8x32xf32>
    %cst_55 = arith.constant 1.000000e+00 : f32
    %276 = vector.broadcast %cst_55 : f32 to vector<8x32xf32>
    %277 = arith.subf %276, %270 : vector<8x32xf32>
    %278 = arith.mulf %277, %275 : vector<8x32xf32>
    %279 = arith.mulf %270, %252 : vector<8x32xf32>
    %280 = arith.addf %278, %279 : vector<8x32xf32>
    %281 = vector.extract_strided_slice %245 {offsets = [0, 128], sizes = [8, 96], strides = [1, 1]} : vector<8x256xf32> to vector<8x96xf32>
    %282 = vector.extract_strided_slice %251 {offsets = [0, 0], sizes = [8, 32], strides = [1, 1]} : vector<8x96xf32> to vector<8x32xf32>
    %283 = vector.extract_strided_slice %281 {offsets = [0, 0], sizes = [8, 32], strides = [1, 1]} : vector<8x96xf32> to vector<8x32xf32>
    %284 = arith.addf %282, %283 : vector<8x32xf32>
    %285 = arith.negf %284 : vector<8x32xf32>
    %286 = math.exp %285 : vector<8x32xf32>
    %cst_56 = arith.constant 1.000000e+00 : f32
    %287 = vector.broadcast %cst_56 : f32 to vector<8x32xf32>
    %288 = arith.addf %287, %286 : vector<8x32xf32>
    %289 = arith.divf %287, %288 : vector<8x32xf32>
    %290 = vector.extract_strided_slice %251 {offsets = [0, 32], sizes = [8, 32], strides = [1, 1]} : vector<8x96xf32> to vector<8x32xf32>
    %291 = vector.extract_strided_slice %281 {offsets = [0, 32], sizes = [8, 32], strides = [1, 1]} : vector<8x96xf32> to vector<8x32xf32>
    %292 = arith.addf %290, %291 : vector<8x32xf32>
    %293 = arith.negf %292 : vector<8x32xf32>
    %294 = math.exp %293 : vector<8x32xf32>
    %cst_57 = arith.constant 1.000000e+00 : f32
    %295 = vector.broadcast %cst_57 : f32 to vector<8x32xf32>
    %296 = arith.addf %295, %294 : vector<8x32xf32>
    %297 = arith.divf %295, %296 : vector<8x32xf32>
    %298 = vector.extract_strided_slice %251 {offsets = [0, 64], sizes = [8, 32], strides = [1, 1]} : vector<8x96xf32> to vector<8x32xf32>
    %299 = vector.extract_strided_slice %281 {offsets = [0, 64], sizes = [8, 32], strides = [1, 1]} : vector<8x96xf32> to vector<8x32xf32>
    %300 = arith.mulf %289, %299 : vector<8x32xf32>
    %301 = arith.addf %298, %300 : vector<8x32xf32>
    %302 = math.tanh %301 : vector<8x32xf32>
    %cst_58 = arith.constant 1.000000e+00 : f32
    %303 = vector.broadcast %cst_58 : f32 to vector<8x32xf32>
    %304 = arith.subf %303, %297 : vector<8x32xf32>
    %305 = arith.mulf %304, %302 : vector<8x32xf32>
    %306 = arith.mulf %297, %253 : vector<8x32xf32>
    %307 = arith.addf %305, %306 : vector<8x32xf32>
    %308 = vector.broadcast %c3_i32 : i32 to vector<8x1xi32>
    %309 = arith.cmpi sgt, %9, %308 : vector<8x1xi32>
    %310 = vector.shape_cast %309 : vector<8x1xi1> to vector<8x1xi1>
    %311 = vector.broadcast %310 : vector<8x1xi1> to vector<8x32xi1>
    %312 = arith.select %311, %280, %252 : vector<8x32xi1>, vector<8x32xf32>
    %313 = vector.broadcast %242 : i32 to vector<8x1xi32>
    %314 = arith.cmpi sgt, %9, %313 : vector<8x1xi32>
    %315 = vector.shape_cast %314 : vector<8x1xi1> to vector<8x1xi1>
    %316 = vector.broadcast %315 : vector<8x1xi1> to vector<8x32xi1>
    %317 = arith.select %316, %307, %253 : vector<8x32xi1>, vector<8x32xf32>
    %318 = tpu.concatenate %312, %317 in 1 : vector<8x32xf32>, vector<8x32xf32> -> vector<8x64xf32>
    %c4_i32 = arith.constant 4 : i32
    %c7_i32_59 = arith.constant 7 : i32
    %319 = arith.subi %c7_i32_59, %c4_i32 : i32
    %cst_60 = arith.constant dense<0.000000e+00> : vector<8x256xf32>
    %320 = tpu.matmul %318, %7, %cst_60 {dimension_numbers = #tpu.dot_dimension_numbers<[1], [0], [0], [1], [0, 0, 1, 1], [], []>} : vector<8x64xf32>, vector<64x256xf32>, vector<8x256xf32> -> vector<8x256xf32>
    %321 = vector.broadcast %8 : vector<1x256xf32> to vector<8x256xf32>
    %322 = arith.addf %320, %321 : vector<8x256xf32>
    %c8_i32_61 = arith.constant 8 : i32
    %323 = arith.muli %c4_i32, %c8_i32_61 : i32
    %324 = arith.index_cast %323 : i32 to index
    %c0_62 = arith.constant 0 : index
    %325 = vector.load %arg7[%324, %c0_62] : memref<64x256xf32, #tpu.memory_space<vmem>>, vector<8x96xf32>
    %c8_i32_63 = arith.constant 8 : i32
    %326 = arith.muli %319, %c8_i32_63 : i32
    %327 = arith.index_cast %326 : i32 to index
    %c128_64 = arith.constant 128 : index
    %328 = vector.load %arg7[%327, %c128_64] : memref<64x256xf32, #tpu.memory_space<vmem>>, vector<8x96xf32>
    %329 = vector.extract_strided_slice %318 {offsets = [0, 0], sizes = [8, 32], strides = [1, 1]} : vector<8x64xf32> to vector<8x32xf32>
    %330 = vector.extract_strided_slice %318 {offsets = [0, 32], sizes = [8, 32], strides = [1, 1]} : vector<8x64xf32> to vector<8x32xf32>
    %331 = vector.extract_strided_slice %322 {offsets = [0, 0], sizes = [8, 96], strides = [1, 1]} : vector<8x256xf32> to vector<8x96xf32>
    %332 = vector.extract_strided_slice %325 {offsets = [0, 0], sizes = [8, 32], strides = [1, 1]} : vector<8x96xf32> to vector<8x32xf32>
    %333 = vector.extract_strided_slice %331 {offsets = [0, 0], sizes = [8, 32], strides = [1, 1]} : vector<8x96xf32> to vector<8x32xf32>
    %334 = arith.addf %332, %333 : vector<8x32xf32>
    %335 = arith.negf %334 : vector<8x32xf32>
    %336 = math.exp %335 : vector<8x32xf32>
    %cst_65 = arith.constant 1.000000e+00 : f32
    %337 = vector.broadcast %cst_65 : f32 to vector<8x32xf32>
    %338 = arith.addf %337, %336 : vector<8x32xf32>
    %339 = arith.divf %337, %338 : vector<8x32xf32>
    %340 = vector.extract_strided_slice %325 {offsets = [0, 32], sizes = [8, 32], strides = [1, 1]} : vector<8x96xf32> to vector<8x32xf32>
    %341 = vector.extract_strided_slice %331 {offsets = [0, 32], sizes = [8, 32], strides = [1, 1]} : vector<8x96xf32> to vector<8x32xf32>
    %342 = arith.addf %340, %341 : vector<8x32xf32>
    %343 = arith.negf %342 : vector<8x32xf32>
    %344 = math.exp %343 : vector<8x32xf32>
    %cst_66 = arith.constant 1.000000e+00 : f32
    %345 = vector.broadcast %cst_66 : f32 to vector<8x32xf32>
    %346 = arith.addf %345, %344 : vector<8x32xf32>
    %347 = arith.divf %345, %346 : vector<8x32xf32>
    %348 = vector.extract_strided_slice %325 {offsets = [0, 64], sizes = [8, 32], strides = [1, 1]} : vector<8x96xf32> to vector<8x32xf32>
    %349 = vector.extract_strided_slice %331 {offsets = [0, 64], sizes = [8, 32], strides = [1, 1]} : vector<8x96xf32> to vector<8x32xf32>
    %350 = arith.mulf %339, %349 : vector<8x32xf32>
    %351 = arith.addf %348, %350 : vector<8x32xf32>
    %352 = math.tanh %351 : vector<8x32xf32>
    %cst_67 = arith.constant 1.000000e+00 : f32
    %353 = vector.broadcast %cst_67 : f32 to vector<8x32xf32>
    %354 = arith.subf %353, %347 : vector<8x32xf32>
    %355 = arith.mulf %354, %352 : vector<8x32xf32>
    %356 = arith.mulf %347, %329 : vector<8x32xf32>
    %357 = arith.addf %355, %356 : vector<8x32xf32>
    %358 = vector.extract_strided_slice %322 {offsets = [0, 128], sizes = [8, 96], strides = [1, 1]} : vector<8x256xf32> to vector<8x96xf32>
    %359 = vector.extract_strided_slice %328 {offsets = [0, 0], sizes = [8, 32], strides = [1, 1]} : vector<8x96xf32> to vector<8x32xf32>
    %360 = vector.extract_strided_slice %358 {offsets = [0, 0], sizes = [8, 32], strides = [1, 1]} : vector<8x96xf32> to vector<8x32xf32>
    %361 = arith.addf %359, %360 : vector<8x32xf32>
    %362 = arith.negf %361 : vector<8x32xf32>
    %363 = math.exp %362 : vector<8x32xf32>
    %cst_68 = arith.constant 1.000000e+00 : f32
    %364 = vector.broadcast %cst_68 : f32 to vector<8x32xf32>
    %365 = arith.addf %364, %363 : vector<8x32xf32>
    %366 = arith.divf %364, %365 : vector<8x32xf32>
    %367 = vector.extract_strided_slice %328 {offsets = [0, 32], sizes = [8, 32], strides = [1, 1]} : vector<8x96xf32> to vector<8x32xf32>
    %368 = vector.extract_strided_slice %358 {offsets = [0, 32], sizes = [8, 32], strides = [1, 1]} : vector<8x96xf32> to vector<8x32xf32>
    %369 = arith.addf %367, %368 : vector<8x32xf32>
    %370 = arith.negf %369 : vector<8x32xf32>
    %371 = math.exp %370 : vector<8x32xf32>
    %cst_69 = arith.constant 1.000000e+00 : f32
    %372 = vector.broadcast %cst_69 : f32 to vector<8x32xf32>
    %373 = arith.addf %372, %371 : vector<8x32xf32>
    %374 = arith.divf %372, %373 : vector<8x32xf32>
    %375 = vector.extract_strided_slice %328 {offsets = [0, 64], sizes = [8, 32], strides = [1, 1]} : vector<8x96xf32> to vector<8x32xf32>
    %376 = vector.extract_strided_slice %358 {offsets = [0, 64], sizes = [8, 32], strides = [1, 1]} : vector<8x96xf32> to vector<8x32xf32>
    %377 = arith.mulf %366, %376 : vector<8x32xf32>
    %378 = arith.addf %375, %377 : vector<8x32xf32>
    %379 = math.tanh %378 : vector<8x32xf32>
    %cst_70 = arith.constant 1.000000e+00 : f32
    %380 = vector.broadcast %cst_70 : f32 to vector<8x32xf32>
    %381 = arith.subf %380, %374 : vector<8x32xf32>
    %382 = arith.mulf %381, %379 : vector<8x32xf32>
    %383 = arith.mulf %374, %330 : vector<8x32xf32>
    %384 = arith.addf %382, %383 : vector<8x32xf32>
    %385 = vector.broadcast %c4_i32 : i32 to vector<8x1xi32>
    %386 = arith.cmpi sgt, %9, %385 : vector<8x1xi32>
    %387 = vector.shape_cast %386 : vector<8x1xi1> to vector<8x1xi1>
    %388 = vector.broadcast %387 : vector<8x1xi1> to vector<8x32xi1>
    %389 = arith.select %388, %357, %329 : vector<8x32xi1>, vector<8x32xf32>
    %390 = vector.broadcast %319 : i32 to vector<8x1xi32>
    %391 = arith.cmpi sgt, %9, %390 : vector<8x1xi32>
    %392 = vector.shape_cast %391 : vector<8x1xi1> to vector<8x1xi1>
    %393 = vector.broadcast %392 : vector<8x1xi1> to vector<8x32xi1>
    %394 = arith.select %393, %384, %330 : vector<8x32xi1>, vector<8x32xf32>
    %395 = tpu.concatenate %389, %394 in 1 : vector<8x32xf32>, vector<8x32xf32> -> vector<8x64xf32>
    %c5_i32 = arith.constant 5 : i32
    %c7_i32_71 = arith.constant 7 : i32
    %396 = arith.subi %c7_i32_71, %c5_i32 : i32
    %cst_72 = arith.constant dense<0.000000e+00> : vector<8x256xf32>
    %397 = tpu.matmul %395, %7, %cst_72 {dimension_numbers = #tpu.dot_dimension_numbers<[1], [0], [0], [1], [0, 0, 1, 1], [], []>} : vector<8x64xf32>, vector<64x256xf32>, vector<8x256xf32> -> vector<8x256xf32>
    %398 = vector.broadcast %8 : vector<1x256xf32> to vector<8x256xf32>
    %399 = arith.addf %397, %398 : vector<8x256xf32>
    %c8_i32_73 = arith.constant 8 : i32
    %400 = arith.muli %c5_i32, %c8_i32_73 : i32
    %401 = arith.index_cast %400 : i32 to index
    %c0_74 = arith.constant 0 : index
    %402 = vector.load %arg7[%401, %c0_74] : memref<64x256xf32, #tpu.memory_space<vmem>>, vector<8x96xf32>
    %c8_i32_75 = arith.constant 8 : i32
    %403 = arith.muli %396, %c8_i32_75 : i32
    %404 = arith.index_cast %403 : i32 to index
    %c128_76 = arith.constant 128 : index
    %405 = vector.load %arg7[%404, %c128_76] : memref<64x256xf32, #tpu.memory_space<vmem>>, vector<8x96xf32>
    %406 = vector.extract_strided_slice %395 {offsets = [0, 0], sizes = [8, 32], strides = [1, 1]} : vector<8x64xf32> to vector<8x32xf32>
    %407 = vector.extract_strided_slice %395 {offsets = [0, 32], sizes = [8, 32], strides = [1, 1]} : vector<8x64xf32> to vector<8x32xf32>
    %408 = vector.extract_strided_slice %399 {offsets = [0, 0], sizes = [8, 96], strides = [1, 1]} : vector<8x256xf32> to vector<8x96xf32>
    %409 = vector.extract_strided_slice %402 {offsets = [0, 0], sizes = [8, 32], strides = [1, 1]} : vector<8x96xf32> to vector<8x32xf32>
    %410 = vector.extract_strided_slice %408 {offsets = [0, 0], sizes = [8, 32], strides = [1, 1]} : vector<8x96xf32> to vector<8x32xf32>
    %411 = arith.addf %409, %410 : vector<8x32xf32>
    %412 = arith.negf %411 : vector<8x32xf32>
    %413 = math.exp %412 : vector<8x32xf32>
    %cst_77 = arith.constant 1.000000e+00 : f32
    %414 = vector.broadcast %cst_77 : f32 to vector<8x32xf32>
    %415 = arith.addf %414, %413 : vector<8x32xf32>
    %416 = arith.divf %414, %415 : vector<8x32xf32>
    %417 = vector.extract_strided_slice %402 {offsets = [0, 32], sizes = [8, 32], strides = [1, 1]} : vector<8x96xf32> to vector<8x32xf32>
    %418 = vector.extract_strided_slice %408 {offsets = [0, 32], sizes = [8, 32], strides = [1, 1]} : vector<8x96xf32> to vector<8x32xf32>
    %419 = arith.addf %417, %418 : vector<8x32xf32>
    %420 = arith.negf %419 : vector<8x32xf32>
    %421 = math.exp %420 : vector<8x32xf32>
    %cst_78 = arith.constant 1.000000e+00 : f32
    %422 = vector.broadcast %cst_78 : f32 to vector<8x32xf32>
    %423 = arith.addf %422, %421 : vector<8x32xf32>
    %424 = arith.divf %422, %423 : vector<8x32xf32>
    %425 = vector.extract_strided_slice %402 {offsets = [0, 64], sizes = [8, 32], strides = [1, 1]} : vector<8x96xf32> to vector<8x32xf32>
    %426 = vector.extract_strided_slice %408 {offsets = [0, 64], sizes = [8, 32], strides = [1, 1]} : vector<8x96xf32> to vector<8x32xf32>
    %427 = arith.mulf %416, %426 : vector<8x32xf32>
    %428 = arith.addf %425, %427 : vector<8x32xf32>
    %429 = math.tanh %428 : vector<8x32xf32>
    %cst_79 = arith.constant 1.000000e+00 : f32
    %430 = vector.broadcast %cst_79 : f32 to vector<8x32xf32>
    %431 = arith.subf %430, %424 : vector<8x32xf32>
    %432 = arith.mulf %431, %429 : vector<8x32xf32>
    %433 = arith.mulf %424, %406 : vector<8x32xf32>
    %434 = arith.addf %432, %433 : vector<8x32xf32>
    %435 = vector.extract_strided_slice %399 {offsets = [0, 128], sizes = [8, 96], strides = [1, 1]} : vector<8x256xf32> to vector<8x96xf32>
    %436 = vector.extract_strided_slice %405 {offsets = [0, 0], sizes = [8, 32], strides = [1, 1]} : vector<8x96xf32> to vector<8x32xf32>
    %437 = vector.extract_strided_slice %435 {offsets = [0, 0], sizes = [8, 32], strides = [1, 1]} : vector<8x96xf32> to vector<8x32xf32>
    %438 = arith.addf %436, %437 : vector<8x32xf32>
    %439 = arith.negf %438 : vector<8x32xf32>
    %440 = math.exp %439 : vector<8x32xf32>
    %cst_80 = arith.constant 1.000000e+00 : f32
    %441 = vector.broadcast %cst_80 : f32 to vector<8x32xf32>
    %442 = arith.addf %441, %440 : vector<8x32xf32>
    %443 = arith.divf %441, %442 : vector<8x32xf32>
    %444 = vector.extract_strided_slice %405 {offsets = [0, 32], sizes = [8, 32], strides = [1, 1]} : vector<8x96xf32> to vector<8x32xf32>
    %445 = vector.extract_strided_slice %435 {offsets = [0, 32], sizes = [8, 32], strides = [1, 1]} : vector<8x96xf32> to vector<8x32xf32>
    %446 = arith.addf %444, %445 : vector<8x32xf32>
    %447 = arith.negf %446 : vector<8x32xf32>
    %448 = math.exp %447 : vector<8x32xf32>
    %cst_81 = arith.constant 1.000000e+00 : f32
    %449 = vector.broadcast %cst_81 : f32 to vector<8x32xf32>
    %450 = arith.addf %449, %448 : vector<8x32xf32>
    %451 = arith.divf %449, %450 : vector<8x32xf32>
    %452 = vector.extract_strided_slice %405 {offsets = [0, 64], sizes = [8, 32], strides = [1, 1]} : vector<8x96xf32> to vector<8x32xf32>
    %453 = vector.extract_strided_slice %435 {offsets = [0, 64], sizes = [8, 32], strides = [1, 1]} : vector<8x96xf32> to vector<8x32xf32>
    %454 = arith.mulf %443, %453 : vector<8x32xf32>
    %455 = arith.addf %452, %454 : vector<8x32xf32>
    %456 = math.tanh %455 : vector<8x32xf32>
    %cst_82 = arith.constant 1.000000e+00 : f32
    %457 = vector.broadcast %cst_82 : f32 to vector<8x32xf32>
    %458 = arith.subf %457, %451 : vector<8x32xf32>
    %459 = arith.mulf %458, %456 : vector<8x32xf32>
    %460 = arith.mulf %451, %407 : vector<8x32xf32>
    %461 = arith.addf %459, %460 : vector<8x32xf32>
    %462 = vector.broadcast %c5_i32 : i32 to vector<8x1xi32>
    %463 = arith.cmpi sgt, %9, %462 : vector<8x1xi32>
    %464 = vector.shape_cast %463 : vector<8x1xi1> to vector<8x1xi1>
    %465 = vector.broadcast %464 : vector<8x1xi1> to vector<8x32xi1>
    %466 = arith.select %465, %434, %406 : vector<8x32xi1>, vector<8x32xf32>
    %467 = vector.broadcast %396 : i32 to vector<8x1xi32>
    %468 = arith.cmpi sgt, %9, %467 : vector<8x1xi32>
    %469 = vector.shape_cast %468 : vector<8x1xi1> to vector<8x1xi1>
    %470 = vector.broadcast %469 : vector<8x1xi1> to vector<8x32xi1>
    %471 = arith.select %470, %461, %407 : vector<8x32xi1>, vector<8x32xf32>
    %472 = tpu.concatenate %466, %471 in 1 : vector<8x32xf32>, vector<8x32xf32> -> vector<8x64xf32>
    %c6_i32 = arith.constant 6 : i32
    %c7_i32_83 = arith.constant 7 : i32
    %473 = arith.subi %c7_i32_83, %c6_i32 : i32
    %cst_84 = arith.constant dense<0.000000e+00> : vector<8x256xf32>
    %474 = tpu.matmul %472, %7, %cst_84 {dimension_numbers = #tpu.dot_dimension_numbers<[1], [0], [0], [1], [0, 0, 1, 1], [], []>} : vector<8x64xf32>, vector<64x256xf32>, vector<8x256xf32> -> vector<8x256xf32>
    %475 = vector.broadcast %8 : vector<1x256xf32> to vector<8x256xf32>
    %476 = arith.addf %474, %475 : vector<8x256xf32>
    %c8_i32_85 = arith.constant 8 : i32
    %477 = arith.muli %c6_i32, %c8_i32_85 : i32
    %478 = arith.index_cast %477 : i32 to index
    %c0_86 = arith.constant 0 : index
    %479 = vector.load %arg7[%478, %c0_86] : memref<64x256xf32, #tpu.memory_space<vmem>>, vector<8x96xf32>
    %c8_i32_87 = arith.constant 8 : i32
    %480 = arith.muli %473, %c8_i32_87 : i32
    %481 = arith.index_cast %480 : i32 to index
    %c128_88 = arith.constant 128 : index
    %482 = vector.load %arg7[%481, %c128_88] : memref<64x256xf32, #tpu.memory_space<vmem>>, vector<8x96xf32>
    %483 = vector.extract_strided_slice %472 {offsets = [0, 0], sizes = [8, 32], strides = [1, 1]} : vector<8x64xf32> to vector<8x32xf32>
    %484 = vector.extract_strided_slice %472 {offsets = [0, 32], sizes = [8, 32], strides = [1, 1]} : vector<8x64xf32> to vector<8x32xf32>
    %485 = vector.extract_strided_slice %476 {offsets = [0, 0], sizes = [8, 96], strides = [1, 1]} : vector<8x256xf32> to vector<8x96xf32>
    %486 = vector.extract_strided_slice %479 {offsets = [0, 0], sizes = [8, 32], strides = [1, 1]} : vector<8x96xf32> to vector<8x32xf32>
    %487 = vector.extract_strided_slice %485 {offsets = [0, 0], sizes = [8, 32], strides = [1, 1]} : vector<8x96xf32> to vector<8x32xf32>
    %488 = arith.addf %486, %487 : vector<8x32xf32>
    %489 = arith.negf %488 : vector<8x32xf32>
    %490 = math.exp %489 : vector<8x32xf32>
    %cst_89 = arith.constant 1.000000e+00 : f32
    %491 = vector.broadcast %cst_89 : f32 to vector<8x32xf32>
    %492 = arith.addf %491, %490 : vector<8x32xf32>
    %493 = arith.divf %491, %492 : vector<8x32xf32>
    %494 = vector.extract_strided_slice %479 {offsets = [0, 32], sizes = [8, 32], strides = [1, 1]} : vector<8x96xf32> to vector<8x32xf32>
    %495 = vector.extract_strided_slice %485 {offsets = [0, 32], sizes = [8, 32], strides = [1, 1]} : vector<8x96xf32> to vector<8x32xf32>
    %496 = arith.addf %494, %495 : vector<8x32xf32>
    %497 = arith.negf %496 : vector<8x32xf32>
    %498 = math.exp %497 : vector<8x32xf32>
    %cst_90 = arith.constant 1.000000e+00 : f32
    %499 = vector.broadcast %cst_90 : f32 to vector<8x32xf32>
    %500 = arith.addf %499, %498 : vector<8x32xf32>
    %501 = arith.divf %499, %500 : vector<8x32xf32>
    %502 = vector.extract_strided_slice %479 {offsets = [0, 64], sizes = [8, 32], strides = [1, 1]} : vector<8x96xf32> to vector<8x32xf32>
    %503 = vector.extract_strided_slice %485 {offsets = [0, 64], sizes = [8, 32], strides = [1, 1]} : vector<8x96xf32> to vector<8x32xf32>
    %504 = arith.mulf %493, %503 : vector<8x32xf32>
    %505 = arith.addf %502, %504 : vector<8x32xf32>
    %506 = math.tanh %505 : vector<8x32xf32>
    %cst_91 = arith.constant 1.000000e+00 : f32
    %507 = vector.broadcast %cst_91 : f32 to vector<8x32xf32>
    %508 = arith.subf %507, %501 : vector<8x32xf32>
    %509 = arith.mulf %508, %506 : vector<8x32xf32>
    %510 = arith.mulf %501, %483 : vector<8x32xf32>
    %511 = arith.addf %509, %510 : vector<8x32xf32>
    %512 = vector.extract_strided_slice %476 {offsets = [0, 128], sizes = [8, 96], strides = [1, 1]} : vector<8x256xf32> to vector<8x96xf32>
    %513 = vector.extract_strided_slice %482 {offsets = [0, 0], sizes = [8, 32], strides = [1, 1]} : vector<8x96xf32> to vector<8x32xf32>
    %514 = vector.extract_strided_slice %512 {offsets = [0, 0], sizes = [8, 32], strides = [1, 1]} : vector<8x96xf32> to vector<8x32xf32>
    %515 = arith.addf %513, %514 : vector<8x32xf32>
    %516 = arith.negf %515 : vector<8x32xf32>
    %517 = math.exp %516 : vector<8x32xf32>
    %cst_92 = arith.constant 1.000000e+00 : f32
    %518 = vector.broadcast %cst_92 : f32 to vector<8x32xf32>
    %519 = arith.addf %518, %517 : vector<8x32xf32>
    %520 = arith.divf %518, %519 : vector<8x32xf32>
    %521 = vector.extract_strided_slice %482 {offsets = [0, 32], sizes = [8, 32], strides = [1, 1]} : vector<8x96xf32> to vector<8x32xf32>
    %522 = vector.extract_strided_slice %512 {offsets = [0, 32], sizes = [8, 32], strides = [1, 1]} : vector<8x96xf32> to vector<8x32xf32>
    %523 = arith.addf %521, %522 : vector<8x32xf32>
    %524 = arith.negf %523 : vector<8x32xf32>
    %525 = math.exp %524 : vector<8x32xf32>
    %cst_93 = arith.constant 1.000000e+00 : f32
    %526 = vector.broadcast %cst_93 : f32 to vector<8x32xf32>
    %527 = arith.addf %526, %525 : vector<8x32xf32>
    %528 = arith.divf %526, %527 : vector<8x32xf32>
    %529 = vector.extract_strided_slice %482 {offsets = [0, 64], sizes = [8, 32], strides = [1, 1]} : vector<8x96xf32> to vector<8x32xf32>
    %530 = vector.extract_strided_slice %512 {offsets = [0, 64], sizes = [8, 32], strides = [1, 1]} : vector<8x96xf32> to vector<8x32xf32>
    %531 = arith.mulf %520, %530 : vector<8x32xf32>
    %532 = arith.addf %529, %531 : vector<8x32xf32>
    %533 = math.tanh %532 : vector<8x32xf32>
    %cst_94 = arith.constant 1.000000e+00 : f32
    %534 = vector.broadcast %cst_94 : f32 to vector<8x32xf32>
    %535 = arith.subf %534, %528 : vector<8x32xf32>
    %536 = arith.mulf %535, %533 : vector<8x32xf32>
    %537 = arith.mulf %528, %484 : vector<8x32xf32>
    %538 = arith.addf %536, %537 : vector<8x32xf32>
    %539 = vector.broadcast %c6_i32 : i32 to vector<8x1xi32>
    %540 = arith.cmpi sgt, %9, %539 : vector<8x1xi32>
    %541 = vector.shape_cast %540 : vector<8x1xi1> to vector<8x1xi1>
    %542 = vector.broadcast %541 : vector<8x1xi1> to vector<8x32xi1>
    %543 = arith.select %542, %511, %483 : vector<8x32xi1>, vector<8x32xf32>
    %544 = vector.broadcast %473 : i32 to vector<8x1xi32>
    %545 = arith.cmpi sgt, %9, %544 : vector<8x1xi32>
    %546 = vector.shape_cast %545 : vector<8x1xi1> to vector<8x1xi1>
    %547 = vector.broadcast %546 : vector<8x1xi1> to vector<8x32xi1>
    %548 = arith.select %547, %538, %484 : vector<8x32xi1>, vector<8x32xf32>
    %549 = tpu.concatenate %543, %548 in 1 : vector<8x32xf32>, vector<8x32xf32> -> vector<8x64xf32>
    %c7_i32_95 = arith.constant 7 : i32
    %c7_i32_96 = arith.constant 7 : i32
    %550 = arith.subi %c7_i32_96, %c7_i32_95 : i32
    %cst_97 = arith.constant dense<0.000000e+00> : vector<8x256xf32>
    %551 = tpu.matmul %549, %7, %cst_97 {dimension_numbers = #tpu.dot_dimension_numbers<[1], [0], [0], [1], [0, 0, 1, 1], [], []>} : vector<8x64xf32>, vector<64x256xf32>, vector<8x256xf32> -> vector<8x256xf32>
    %552 = vector.broadcast %8 : vector<1x256xf32> to vector<8x256xf32>
    %553 = arith.addf %551, %552 : vector<8x256xf32>
    %c8_i32_98 = arith.constant 8 : i32
    %554 = arith.muli %c7_i32_95, %c8_i32_98 : i32
    %555 = arith.index_cast %554 : i32 to index
    %c0_99 = arith.constant 0 : index
    %556 = vector.load %arg7[%555, %c0_99] : memref<64x256xf32, #tpu.memory_space<vmem>>, vector<8x96xf32>
    %c8_i32_100 = arith.constant 8 : i32
    %557 = arith.muli %550, %c8_i32_100 : i32
    %558 = arith.index_cast %557 : i32 to index
    %c128_101 = arith.constant 128 : index
    %559 = vector.load %arg7[%558, %c128_101] : memref<64x256xf32, #tpu.memory_space<vmem>>, vector<8x96xf32>
    %560 = vector.extract_strided_slice %549 {offsets = [0, 0], sizes = [8, 32], strides = [1, 1]} : vector<8x64xf32> to vector<8x32xf32>
    %561 = vector.extract_strided_slice %549 {offsets = [0, 32], sizes = [8, 32], strides = [1, 1]} : vector<8x64xf32> to vector<8x32xf32>
    %562 = vector.extract_strided_slice %553 {offsets = [0, 0], sizes = [8, 96], strides = [1, 1]} : vector<8x256xf32> to vector<8x96xf32>
    %563 = vector.extract_strided_slice %556 {offsets = [0, 0], sizes = [8, 32], strides = [1, 1]} : vector<8x96xf32> to vector<8x32xf32>
    %564 = vector.extract_strided_slice %562 {offsets = [0, 0], sizes = [8, 32], strides = [1, 1]} : vector<8x96xf32> to vector<8x32xf32>
    %565 = arith.addf %563, %564 : vector<8x32xf32>
    %566 = arith.negf %565 : vector<8x32xf32>
    %567 = math.exp %566 : vector<8x32xf32>
    %cst_102 = arith.constant 1.000000e+00 : f32
    %568 = vector.broadcast %cst_102 : f32 to vector<8x32xf32>
    %569 = arith.addf %568, %567 : vector<8x32xf32>
    %570 = arith.divf %568, %569 : vector<8x32xf32>
    %571 = vector.extract_strided_slice %556 {offsets = [0, 32], sizes = [8, 32], strides = [1, 1]} : vector<8x96xf32> to vector<8x32xf32>
    %572 = vector.extract_strided_slice %562 {offsets = [0, 32], sizes = [8, 32], strides = [1, 1]} : vector<8x96xf32> to vector<8x32xf32>
    %573 = arith.addf %571, %572 : vector<8x32xf32>
    %574 = arith.negf %573 : vector<8x32xf32>
    %575 = math.exp %574 : vector<8x32xf32>
    %cst_103 = arith.constant 1.000000e+00 : f32
    %576 = vector.broadcast %cst_103 : f32 to vector<8x32xf32>
    %577 = arith.addf %576, %575 : vector<8x32xf32>
    %578 = arith.divf %576, %577 : vector<8x32xf32>
    %579 = vector.extract_strided_slice %556 {offsets = [0, 64], sizes = [8, 32], strides = [1, 1]} : vector<8x96xf32> to vector<8x32xf32>
    %580 = vector.extract_strided_slice %562 {offsets = [0, 64], sizes = [8, 32], strides = [1, 1]} : vector<8x96xf32> to vector<8x32xf32>
    %581 = arith.mulf %570, %580 : vector<8x32xf32>
    %582 = arith.addf %579, %581 : vector<8x32xf32>
    %583 = math.tanh %582 : vector<8x32xf32>
    %cst_104 = arith.constant 1.000000e+00 : f32
    %584 = vector.broadcast %cst_104 : f32 to vector<8x32xf32>
    %585 = arith.subf %584, %578 : vector<8x32xf32>
    %586 = arith.mulf %585, %583 : vector<8x32xf32>
    %587 = arith.mulf %578, %560 : vector<8x32xf32>
    %588 = arith.addf %586, %587 : vector<8x32xf32>
    %589 = vector.extract_strided_slice %553 {offsets = [0, 128], sizes = [8, 96], strides = [1, 1]} : vector<8x256xf32> to vector<8x96xf32>
    %590 = vector.extract_strided_slice %559 {offsets = [0, 0], sizes = [8, 32], strides = [1, 1]} : vector<8x96xf32> to vector<8x32xf32>
    %591 = vector.extract_strided_slice %589 {offsets = [0, 0], sizes = [8, 32], strides = [1, 1]} : vector<8x96xf32> to vector<8x32xf32>
    %592 = arith.addf %590, %591 : vector<8x32xf32>
    %593 = arith.negf %592 : vector<8x32xf32>
    %594 = math.exp %593 : vector<8x32xf32>
    %cst_105 = arith.constant 1.000000e+00 : f32
    %595 = vector.broadcast %cst_105 : f32 to vector<8x32xf32>
    %596 = arith.addf %595, %594 : vector<8x32xf32>
    %597 = arith.divf %595, %596 : vector<8x32xf32>
    %598 = vector.extract_strided_slice %559 {offsets = [0, 32], sizes = [8, 32], strides = [1, 1]} : vector<8x96xf32> to vector<8x32xf32>
    %599 = vector.extract_strided_slice %589 {offsets = [0, 32], sizes = [8, 32], strides = [1, 1]} : vector<8x96xf32> to vector<8x32xf32>
    %600 = arith.addf %598, %599 : vector<8x32xf32>
    %601 = arith.negf %600 : vector<8x32xf32>
    %602 = math.exp %601 : vector<8x32xf32>
    %cst_106 = arith.constant 1.000000e+00 : f32
    %603 = vector.broadcast %cst_106 : f32 to vector<8x32xf32>
    %604 = arith.addf %603, %602 : vector<8x32xf32>
    %605 = arith.divf %603, %604 : vector<8x32xf32>
    %606 = vector.extract_strided_slice %559 {offsets = [0, 64], sizes = [8, 32], strides = [1, 1]} : vector<8x96xf32> to vector<8x32xf32>
    %607 = vector.extract_strided_slice %589 {offsets = [0, 64], sizes = [8, 32], strides = [1, 1]} : vector<8x96xf32> to vector<8x32xf32>
    %608 = arith.mulf %597, %607 : vector<8x32xf32>
    %609 = arith.addf %606, %608 : vector<8x32xf32>
    %610 = math.tanh %609 : vector<8x32xf32>
    %cst_107 = arith.constant 1.000000e+00 : f32
    %611 = vector.broadcast %cst_107 : f32 to vector<8x32xf32>
    %612 = arith.subf %611, %605 : vector<8x32xf32>
    %613 = arith.mulf %612, %610 : vector<8x32xf32>
    %614 = arith.mulf %605, %561 : vector<8x32xf32>
    %615 = arith.addf %613, %614 : vector<8x32xf32>
    %616 = vector.broadcast %c7_i32_95 : i32 to vector<8x1xi32>
    %617 = arith.cmpi sgt, %9, %616 : vector<8x1xi32>
    %618 = vector.shape_cast %617 : vector<8x1xi1> to vector<8x1xi1>
    %619 = vector.broadcast %618 : vector<8x1xi1> to vector<8x32xi1>
    %620 = arith.select %619, %588, %560 : vector<8x32xi1>, vector<8x32xf32>
    %621 = vector.broadcast %550 : i32 to vector<8x1xi32>
    %622 = arith.cmpi sgt, %9, %621 : vector<8x1xi32>
    %623 = vector.shape_cast %622 : vector<8x1xi1> to vector<8x1xi1>
    %624 = vector.broadcast %623 : vector<8x1xi1> to vector<8x32xi1>
    %625 = arith.select %624, %615, %561 : vector<8x32xi1>, vector<8x32xf32>
    %626 = tpu.concatenate %620, %625 in 1 : vector<8x32xf32>, vector<8x32xf32> -> vector<8x64xf32>
    %c8_i32_108 = arith.constant 8 : i32
    %cst_109 = arith.constant 0.000000e+00 : f32
    %627 = vector.broadcast %cst_109 : f32 to vector<8x64xf32>
    %628 = tpu.concatenate %626, %627 in 1 : vector<8x64xf32>, vector<8x64xf32> -> vector<8x128xf32>
    %c0_110 = arith.constant 0 : index
    %c0_111 = arith.constant 0 : index
    %629 = vector.load %arg6[%c0_110, %c0_111] : memref<8x128xf32, #tpu.memory_space<vmem>>, vector<8x128xf32>
    tpu.vector_store %arg6[%c0_110, %c0_111], %628 {strides = array<i32>} : memref<8x128xf32, #tpu.memory_space<vmem>>, vector<8x128xf32>,
    return
  }
}

</mosaic_0001>

<bundles_post_ra>
// kernel: rnn_utt_encoder_forward.1
= control target key start
LH: loop header
LB: loop body
LE: loop exit
PB: predicated region body
PF: predicated region fallthrough
CT: control target
= control target key end

     0   :  { %v1696_v7 = vmov 0.0   ;;  %vm52_vm0 = vcmask 261120   ;;  %s2203_s0 = inlined_call_operand.vmem [shape: f32[64,32], index: 0, kind: input, shape index: {}]   ;;  %s2204_s1 = inlined_call_operand.vmem [shape: s32[8,1], index: 1, kind: input, shape index: {}]   ;;  %s2205_s2 = inlined_call_operand.vmem [shape: f32[32,256], index: 2, kind: input, shape index: {}]   ;;  %s2206_s3 = inlined_call_operand.vmem [shape: f32[1,256], index: 3, kind: input, shape index: {}]   ;;  %s2207_s4 = inlined_call_operand.vmem [shape: f32[64,256], index: 4, kind: input, shape index: {}]   ;;  %s2208_s5 = inlined_call_operand.vmem [shape: f32[1,256], index: 5, kind: input, shape index: {}]   ;;  %s2209_s6 = inlined_call_operand.hbm [shape: f32[8,128], index: 6, kind: output, shape index: {}]  }
   0x1   :  { %v33_v0 = vld [vmem:[%s2205_s2 + $0x8] sm:$0xff]  ;;  %v35_v1 = vld [vmem:[%s2205_s2 + $0x18] sm:$0xff]  ;;  %v32_v5 = vld [vmem:[%s2205_s2] sm:$0xff]  ;;  %141 = vmatprep.mubr.f32.mxu0 %v1696_v7  ;;  %303 = vmatprep.mubr.f32.mxu1 %v1696_v7 }
   0x2   :  { %v207_v2 = vld [vmem:[%s2207_s4 + $0x8] sm:$0xff]  ;;  %v1432_v3 = vpack.c.bf16 %v35_v1, %v33_v0  ;;  %v209_v4 = vld [vmem:[%s2207_s4 + $0x18] sm:$0xff]  ;;  %v34_v6 = vld [vmem:[%s2205_s2 + $0x10] sm:$0xff] }
   0x3   :  { %v1757_v8 = vpack.c.bf16 %v209_v4, %v207_v2  ;;  %v1434_v9 = vpack.c.bf16 %v34_v6, %v32_v5  ;;  %v206_v10 = vld [vmem:[%s2207_s4] sm:$0xff]  ;;  %v208_v11 = vld [vmem:[%s2207_s4 + $0x10] sm:$0xff]  ;;  %v37_v12 = vld [vmem:[%s2205_s2 + $0x28] sm:$0xff] }
   0x4   :  { %1433 = vmatprep.subr.bf16.mxu0 %v1432_v3  ;;  %v1768_v13 = vpack.c.bf16 %v208_v11, %v206_v10  ;;  %v39_v14 = vld [vmem:[%s2205_s2 + $0x38] sm:$0xff]  ;;  %v211_v15 = vld [vmem:[%s2207_s4 + $0x28] sm:$0xff]  ;;  %v36_v19 = vld [vmem:[%s2205_s2 + $0x20] sm:$0xff] }
   0x5   :  { %v213_v16 = vld [vmem:[%s2207_s4 + $0x38] sm:$0xff]  ;;  %1441 = vmatprep.subr.bf16.mxu1 %v1757_v8  ;;  %1435 = vmatpush1.bf16.msra.mxu0 %v1434_v9  ;;  %v1436_v17 = vpack.c.bf16 %v39_v14, %v37_v12  ;;  %v38_v20 = vld [vmem:[%s2205_s2 + $0x30] sm:$0xff]  ;;  %v210_v21 = vld [vmem:[%s2207_s4 + $0x20] sm:$0xff] }
   0x6   :  { %v1780_v18 = vpack.c.bf16 %v213_v16, %v211_v15  ;;  %1443 = vmatpush1.bf16.msra.mxu1 %v1768_v13  ;;  %v1438_v22 = vpack.c.bf16 %v38_v20, %v36_v19  ;;  %v212_v23 = vld [vmem:[%s2207_s4 + $0x30] sm:$0xff]  ;;  %v215_v24 = vld [vmem:[%s2207_s4 + $0x48] sm:$0xff]  ;;  %v217_v26 = vld [vmem:[%s2207_s4 + $0x58] sm:$0xff] }
   0x7   :  { %1437 = vmatprep.subr.bf16.mxu0 %v1436_v17  ;;  %v1799_v25 = vpack.c.bf16 %v212_v23, %v210_v21  ;;  %v214_v27 = vld [vmem:[%s2207_s4 + $0x40] sm:$0xff]  ;;  %v216_v28 = vld [vmem:[%s2207_s4 + $0x50] sm:$0xff]  ;;  %v1810_v29 = vpack.c.bf16 %v217_v26, %v215_v24  ;;  %v219_v30 = vld [vmem:[%s2207_s4 + $0x68] sm:$0xff] }
   0x8   :  { %1445 = vmatprep.subr.bf16.mxu1 %v1780_v18  ;;  %v221_v31 = vld [vmem:[%s2207_s4 + $0x78] sm:$0xff]  ;;  %v24_v32 = vld [vmem:[%s2203_s0] sm:$0xff]  ;;  %v1822_v33 = vpack.c.bf16 %v216_v28, %v214_v27  ;;  %v220_v36 = vld [vmem:[%s2207_s4 + $0x70] sm:$0xff] }
   0x9   :  { %1439 = vmatpush1.bf16.msra.mxu0 %v1438_v22  ;;  %v1826_v34 = vpack.c.bf16 %v221_v31, %v219_v30  ;;  %v218_v35 = vld [vmem:[%s2207_s4 + $0x60] sm:$0xff] }
   0xa   :  { %1447 = vmatpush1.bf16.msra.mxu1 %v1799_v25  ;;  %1473 = vmatprep.subr.bf16.mxu0 %v1757_v8 }
   0xb   :  { %1449 = vmatprep.subr.bf16.mxu1 %v1810_v29 }
   0xc   :  { %1401 = vmatmul.mubr.msk.f32.vlgmr.msra.gmra.mrb[0].mxu0 %vm52_vm0, %v24_v32 }
   0xd   :  { %11 = vsyncpa [#allocation4], 0  ;;  %147 = vmatprep.mubr.f32.mxu0 %v1696_v7  ;;  %v25_v37 = vld [vmem:[%s2203_s0 + $0x8] sm:$0xff]  ;;  %1475 = vmatpush1.bf16.msra.mxu0 %v1768_v13  ;;  %v1841_v38 = vpack.c.bf16 %v220_v36, %v218_v35  ;;  %v26_v39 = vld [vmem:[%s2203_s0 + $0x10] sm:$0xff]  ;;  %v42_v45 = vlaneseq  ;;  %v1697_v61 = vmov 0   ;;  %vm235_vm5 = vcmask 523264  }
   0xe   :  { %1451 = vmatpush1.bf16.msra.mxu1 %v1822_v33  ;;  %1477 = vmatprep.subr.bf16.mxu0 %v1780_v18  ;;  %v27_v40 = vld [vmem:[%s2203_s0 + $0x18] sm:$0xff]  ;;  %v28_v41 = vld [vmem:[%s2203_s0 + $0x20] sm:$0xff]  ;;  %v29_v42 = vld [vmem:[%s2203_s0 + $0x28] sm:$0xff]  ;;  %s1700_s14 = smov 32   ;;  %s1701_s15 = smov [#allocation3]  }
   0xf   :  { %1453 = vmatprep.subr.bf16.mxu1 %v1826_v34  ;;  %v30_v43 = vld [vmem:[%s2203_s0 + $0x30] sm:$0xff]  ;;  %v31_v44 = vld [vmem:[%s2203_s0 + $0x38] sm:$0xff]  ;;  %v43_v46 = vshrl.u32 %v42_v45, 7  ;;  %v40_v48 = vld [vmem:[%s2206_s3] sm:$0x3]  ;;  %1574 = vset.pattern.permute.xlu0 %v1697_v61  ;;  %s1698_s3 = smov 64  }
  0x10   :  { %1402 = vmatmul.mubr.msk.f32.gmra.mrb[2].mxu0 %vm52_vm0, %v25_v37  ;;  %v222_v55 = vld [vmem:[%s2208_s5] sm:$0x3]  ;;  %1575 = vset.pattern.permute.xlu1 %v1697_v61  ;;  %s1393_s16 = sshll.u32 %s1701_s15, 4  ;;  %s1394_s16 = int_to_ptr.vmem [resolvable:$true] %s1393_s16 }
  0x11   :  { %153 = vmatprep.mubr.f32.mxu0 %v1696_v7  ;;  %1479 = vmatpush1.bf16.msra.mxu0 %v1799_v25  ;;  %v48_v47 = vsub.s32 1, %v43_v46  ;;  %v44_v49 = vsub.s32 0, %v43_v46  ;;  %s1672_s17 = scalar_lea.vmem %s1394_s16, 128  ;;  %p1677_p1 = scmp.lt.s32.totalorder %s1394_s16, %s1394_s16 }
  0x12   :  { %1455 = vmatpush1.bf16.msra.mxu1 %v1841_v38  ;;  %1481 = vmatprep.subr.bf16.mxu0 %v1810_v29  ;;  %p1673_p0 = scmp.ne.s32.totalorder %s1394_s16, %s1672_s17  ;;  %p1678_p2 = scmp.lt.s32.totalorder %s1672_s17, %s1672_s17 }
  0x13   :  { %1457 = vmatprep.subr.bf16.mxu1 %v1757_v8  ;;  %v49_v51 = vrot.slane %v40_v48, %v48_v47  ;;  %v45_v54 = vrot.slane %v40_v48, %v44_v49  ;;  %v1905_v59 = vrot.slane %v222_v55, %v44_v49  ;;  %v1914_v3 = vrot.slane %v222_v55, %v48_v47 }
  0x14   :  { %1403 = vmatmul.mubr.msk.f32.gmra.mrb[4].mxu0 %vm52_vm0, %v26_v39  ;;  %p1679_p3 = por %p1678_p2, %p1677_p1 }
  0x15   :  { %304 = vmatmul.mubr.f32.vlgmr.msra.gmra.mrb[0].mxu1 %v1696_v7  ;;  %159 = vmatprep.mubr.f32.mxu0 %v1696_v7 }
  0x16   :  { %1459 = vmatpush1.bf16.msra.mxu1 %v1768_v13  ;;  %450 = vmatprep.mubr.f32.mxu1 %v1696_v7  ;;  %p1680_p4 = pnand %p1679_p3, %p1673_p0 }
  0x17   :  { %1461 = vmatprep.subr.bf16.mxu1 %v1780_v18  ;;  %1483 = vmatpush1.bf16.msra.mxu0 %v1822_v33 }
  0x18   :  { %1404 = vmatmul.mubr.msk.f32.gmra.mrb[6].mxu0 %vm52_vm0, %v27_v40  ;;  %1485 = vmatprep.subr.bf16.mxu0 %v1826_v34 }
  0x19   :  { %165 = vmatprep.mubr.f32.mxu0 %v1696_v7 }
  0x1a   :  { %1463 = vmatpush1.bf16.msra.mxu1 %v1799_v25 }
  0x1b   :  { %1465 = vmatprep.subr.bf16.mxu1 %v1810_v29  ;;  %1487 = vmatpush1.bf16.msra.mxu0 %v1841_v38 }
  0x1c   :  { %1405 = vmatmul.mubr.msk.f32.gmra.mrb[8].mxu0 %vm52_vm0, %v28_v41  ;;  %1505 = vmatprep.subr.bf16.mxu0 %v1757_v8 }
  0x1d   :  { %171 = vmatprep.mubr.f32.mxu0 %v1696_v7 }
  0x1e   :  { %1467 = vmatpush1.bf16.msra.mxu1 %v1822_v33 }
  0x1f   :  { %1469 = vmatprep.subr.bf16.mxu1 %v1826_v34 }
  0x20   :  { %1406 = vmatmul.mubr.msk.f32.gmra.mrb[10].mxu0 %vm52_vm0, %v29_v42 }
  0x21   :  { %177 = vmatprep.mubr.f32.mxu0 %v1696_v7 }
  0x22   :  { %1471 = vmatpush1.bf16.msra.mxu1 %v1841_v38 }
  0x23   :  { %1489 = vmatprep.subr.bf16.mxu1 %v1757_v8 }
  0x24   :  { %1407 = vmatmul.mubr.msk.f32.gmra.mrb[12].mxu0 %vm52_vm0, %v30_v43 }
  0x25   :  { %183 = vmatprep.mubr.f32.mxu0 %v1696_v7 }
  0x28   :  { %1408 = vmatmul.mubr.msk.f32.gmra.mrb[14].mxu0 %vm52_vm0, %v31_v44  ;;  %v1942_v44 = vld [vmem:[%s2204_s1] sm:$0xff]  ;;  %s1699_s1 = smov 96  }
  0x29   :  { %600 = vmatprep.mubr.f32.mxu0 %v1696_v7  ;;  %vm364_vm1 = vcmp.gt.s32.totalorder %v1942_v44, 0  ;;  %vm371_vm2 = vcmp.gt.s32.totalorder %v1942_v44, 7  ;;  %vm514_vm6 = vcmp.gt.s32.totalorder %v1942_v44, 1  ;;  %vm521_vm7 = vcmp.gt.s32.totalorder %v1942_v44, 6 }
  0x2a   :  { %v365_v45 = vsel %vm364_vm1, 1, %v1697_v61  ;;  %vm664_vm10 = vcmp.gt.s32.totalorder %v1942_v44, 2  ;;  %vm671_vm11 = vcmp.gt.s32.totalorder %v1942_v44, 5  ;;  %vm814_vm14 = vcmp.gt.s32.totalorder %v1942_v44, 3 }
  0x2b   :  { %vm821_vm15 = vcmp.gt.s32.totalorder %v1942_v44, 4 }
  0xdf   :  { %v143_v50 = vpop.f32.mrb[0].mxu0 }
  0xe0   :  { %v145_v52 = vpop.f32.mrb[1].mxu0  ;;  %v144_v35 = vadd.f32 %v143_v50, %v45_v54 }
  0xe1   :  { %v1898_v53 = vadd.f32 %v145_v52, %v49_v51 }
  0xe3   :  { %v149_v56 = vpop.f32.mrb[2].mxu0 }
  0xe4   :  { %v1903_v57 = vadd.f32 %v149_v56, %v45_v54  ;;  %v151_v58 = vpop.f32.mrb[3].mxu0 }
  0xe5   :  { %v1907_v60 = vadd.f32 %v151_v58, %v49_v51 }
  0xe7   :  { %v155_v62 = vpop.f32.mrb[4].mxu0 }
  0xe8   :  { %v305_v63 = vpop.f32.mrb[0].mxu1  ;;  %v1911_v0 = vadd.f32 %v155_v62, %v45_v54  ;;  %v157_v1 = vpop.f32.mrb[5].mxu0 }
  0xe9   :  { %v306_v2 = vadd.f32 %v305_v63, %v1905_v59  ;;  %v307_v4 = vpop.f32.mrb[1].mxu1  ;;  %v1916_v5 = vadd.f32 %v157_v1, %v49_v51  ;;  %v372_v63 = vsel %vm371_vm2, 1, %v1697_v61 }
  0xea   :  { %v308_v11 = vadd.f32 %v307_v4, %v1914_v3 }
  0xeb   :  { %320 = vrot.lane.b32.xlu0 %v306_v2, %s1698_s3  ;;  %v161_v6 = vpop.f32.mrb[6].mxu0  ;;  %v312_v36 = vadd.f32 %v306_v2, %v144_v35 }
  0xec   :  { %v1919_v9 = vadd.f32 %v161_v6, %v45_v54  ;;  %v163_v10 = vpop.f32.mrb[7].mxu0 }
  0xed   :  { %v1922_v12 = vadd.f32 %v163_v10, %v49_v51  ;;  %v1409_v37 = vmul.f32 -1.442695, %v312_v36 }
  0xef   :  { %346 = vrot.lane.b32.xlu0 %v308_v11, %s1698_s3  ;;  %v167_v14 = vpop.f32.mrb[8].mxu0  ;;  %1576 = vpow2.f32 %v1409_v37 }
  0xf0   :  { %v1925_v15 = vadd.f32 %v167_v14, %v45_v54  ;;  %v169_v16 = vpop.f32.mrb[9].mxu0 }
  0xf1   :  { %v1927_v17 = vadd.f32 %v169_v16, %v49_v51 }
  0xf3   :  { %v173_v19 = vpop.f32.mrb[10].mxu0  ;;  %367 = vperm.xlu0 %1574, %v365_v45  }
  0xf4   :  { %v1929_v20 = vadd.f32 %v173_v19, %v45_v54  ;;  %v175_v21 = vpop.f32.mrb[11].mxu0 }
  0xf5   :  { %v1931_v22 = vadd.f32 %v175_v21, %v49_v51 }
  0xf7   :  { %v179_v23 = vpop.f32.mrb[12].mxu0 }
  0xf8   :  { %v1933_v24 = vadd.f32 %v179_v23, %v45_v54  ;;  %v181_v26 = vpop.f32.mrb[13].mxu0 }
  0xf9   :  { %v1935_v27 = vadd.f32 %v181_v26, %v49_v51  ;;  %v1577_v41 = vpop.eup %1576 }
  0xfa   :  { %v316_v42 = vadd.f32 1.0, %v1577_v41 }
  0xfb   :  { %v185_v28 = vpop.f32.mrb[14].mxu0 }
  0xfc   :  { %v1937_v30 = vadd.f32 %v185_v28, %v45_v54  ;;  %v187_v31 = vpop.f32.mrb[15].mxu0 }
  0xfd   :  { %v188_v32 = vadd.f32 %v187_v31, %v49_v51 }
  0xff   :  { %v338_v39 = vadd.f32 %v308_v11, %v188_v32 }
 0x101   :  { %v1410_v40 = vmul.f32 -1.442695, %v338_v39 }
 0x103   :  { %1578 = vpow2.f32 %v1410_v40 }
 0x104   :  { %1580 = vrcp.f32 %v316_v42 }
 0x10d   :  { %v1579_v43 = vpop.eup %1578 }
 0x10e   :  { %v342_v46 = vadd.f32 1.0, %v1579_v43  ;;  %v1581_v47 = vpop.eup %1580 }
 0x10f   :  { %v330_v2 = vsub.f32 1.0, %v1581_v47  ;;  %v336_v10 = vmul.f32 0.0, %v1581_v47 }
 0x110   :  { %1582 = vrcp.f32 %v342_v46 }
 0x11a   :  { %v1583_v50 = vpop.eup %1582 }
 0x11b   :  { %v356_v21 = vsub.f32 1.0, %v1583_v50  ;;  %v362_v28 = vmul.f32 0.0, %v1583_v50 }
 0x15d   :  { %v321_v48 = vpop.permute.xlu0 %320 }
 0x15e   :  { %v323_v49 = vmul.f32 %v1581_v47, %v321_v48 }
 0x160   :  { %325 = vrot.lane.b32.xlu1 %v323_v49, %s1698_s3 }
 0x161   :  { %v347_v51 = vpop.permute.xlu0 %346 }
 0x162   :  { %v349_v52 = vmul.f32 %v1583_v50, %v347_v51 }
 0x164   :  { %351 = vrot.lane.b32.xlu1 %v349_v52, %s1698_s3 }
 0x172   :  { %v1952_v6 = vpop.permute.xlu0 %367 }
 0x173   :  { %vm369_vm3 = vcmp.eq.s32.totalorder %v1952_v6, 1 }
 0x1d2   :  { %v326_v54 = vpop.permute.xlu1 %325 }
 0x1d3   :  { %v328_v55 = vadd.f32 %v326_v54, %v144_v35 }
 0x1d5   :  { %1584 = vtanh.f32 %v328_v55 }
 0x1d6   :  { %v352_v56 = vpop.permute.xlu1 %351 }
 0x1d7   :  { %v354_v58 = vadd.f32 %v352_v56, %v188_v32 }
 0x1d9   :  { %1586 = vtanh.f32 %v354_v58 }
 0x1df   :  { %v1585_v62 = vpop.eup %1584 }
 0x1e0   :  { %332 = vrot.lane.b32.xlu1 %v1585_v62, %s1699_s1  ;;  %v515_v62 = vsel %vm514_vm6, 1, %v1697_v61 }
 0x1e3   :  { %v1587_v1 = vpop.eup %1586 }
 0x1e4   :  { %374 = vperm.xlu1 %1575, %v372_v63   ;;  %358 = vrot.lane.b32.xlu0 %v1587_v1, %s1699_s1 }
 0x252   :  { %v333_v4 = vpop.permute.xlu1 %332 }
 0x253   :  { %v335_v11 = vmul.f32 %v333_v4, %v330_v2 }
 0x255   :  { %v337_v14 = vadd.f32 %v336_v10, %v335_v11 }
 0x256   :  { %v359_v19 = vpop.permute.xlu0 %358 }
 0x257   :  { %v370_v16 = vsel %vm369_vm3, %v337_v14, 0.0  ;;  %v361_v23 = vmul.f32 %v359_v19, %v356_v21  ;;  %v522_v14 = vsel %vm521_vm7, 1, %v1697_v61 }
 0x258   :  { %379 = vrot.lane.b32.xlu1 %v370_v16, %s1699_s1 }
 0x259   :  { %v363_v31 = vadd.f32 %v362_v28, %v361_v23 }
 0x263   :  { %v1958_v26 = vpop.permute.xlu1 %374 }
 0x264   :  { %vm376_vm4 = vcmp.eq.s32.totalorder %v1958_v26, 1 }
 0x265   :  { %v377_v32 = vsel %vm376_vm4, %v363_v31, 0.0 }
 0x2ca   :  { %v380_v35 = vpop.permute.xlu1 %379 }
 0x2cb   :  { %v1964_v36 = vsel %vm52_vm0, %v380_v35, %v377_v32 }
 0x2cc   :  { %1411 = vmatmul.mubr.msk.f32.vlgmr.msra.gmra.mrb[2].mxu1 %vm235_vm5, %v1964_v36 }
 0x2cd   :  { %1491 = vmatpush1.bf16.msra.mxu1 %v1768_v13  ;;  %750 = vmatprep.mubr.f32.mxu1 %v1696_v7 }
 0x2ce   :  { %1493 = vmatprep.subr.bf16.mxu1 %v1780_v18 }
 0x2d1   :  { %1495 = vmatpush1.bf16.msra.mxu1 %v1799_v25 }
 0x2d2   :  { %1497 = vmatprep.subr.bf16.mxu1 %v1810_v29 }
 0x2d5   :  { %1499 = vmatpush1.bf16.msra.mxu1 %v1822_v33 }
 0x2d6   :  { %1501 = vmatprep.subr.bf16.mxu1 %v1826_v34 }
 0x2d9   :  { %1503 = vmatpush1.bf16.msra.mxu1 %v1841_v38 }
 0x2da   :  { %1521 = vmatprep.subr.bf16.mxu1 %v1757_v8 }
 0x39f   :  { %v452_v37 = vpop.f32.mrb[2].mxu1 }
 0x3a0   :  { %v453_v39 = vadd.f32 %v452_v37, %v1905_v59  ;;  %v454_v40 = vpop.f32.mrb[3].mxu1 }
 0x3a1   :  { %v455_v41 = vadd.f32 %v454_v40, %v1914_v3 }
 0x3a2   :  { %467 = vrot.lane.b32.xlu0 %v453_v39, %s1698_s3  ;;  %v459_v42 = vadd.f32 %v453_v39, %v1903_v57 }
 0x3a3   :  { %496 = vrot.lane.b32.xlu1 %v455_v41, %s1698_s3  ;;  %v488_v43 = vadd.f32 %v455_v41, %v1935_v27 }
 0x3a4   :  { %v1412_v45 = vmul.f32 -1.442695, %v459_v42 }
 0x3a5   :  { %v1413_v46 = vmul.f32 -1.442695, %v488_v43 }
 0x3a6   :  { %1588 = vpow2.f32 %v1412_v45 }
 0x3a7   :  { %1590 = vpow2.f32 %v1413_v46 }
 0x3b0   :  { %v1589_v47 = vpop.eup %1588 }
 0x3b1   :  { %v1591_v48 = vpop.eup %1590  ;;  %v463_v49 = vadd.f32 1.0, %v1589_v47 }
 0x3b2   :  { %v492_v50 = vadd.f32 1.0, %v1591_v48 }
 0x3b3   :  { %1592 = vrcp.f32 %v463_v49 }
 0x3b4   :  { %1594 = vrcp.f32 %v492_v50 }
 0x3bd   :  { %v1593_v51 = vpop.eup %1592 }
 0x3be   :  { %v1595_v54 = vpop.eup %1594 }
 0x3bf   :  { %v506_v35 = vsub.f32 1.0, %v1595_v54  ;;  %v512_v40 = vmul.f32 %v1595_v54, %v1964_v36 }
 0x414   :  { %v468_v52 = vpop.permute.xlu0 %467 }
 0x415   :  { %v470_v55 = vmul.f32 %v1593_v51, %v468_v52  ;;  %v497_v56 = vpop.permute.xlu1 %496 }
 0x416   :  { %v499_v58 = vmul.f32 %v1595_v54, %v497_v56 }
 0x417   :  { %472 = vrot.lane.b32.xlu0 %v470_v55, %s1698_s3 }
 0x418   :  { %501 = vrot.lane.b32.xlu1 %v499_v58, %s1698_s3 }
 0x41b   :  { %517 = vperm.xlu0 %1574, %v515_v62  }
 0x41f   :  { %483 = vrot.lane.b32.xlu0 %v1964_v36, %s1700_s14 }
 0x489   :  { %v473_v63 = vpop.permute.xlu0 %472 }
 0x48a   :  { %v475_v1 = vadd.f32 %v473_v63, %v1903_v57  ;;  %v502_v2 = vpop.permute.xlu1 %501  ;;  %v477_v57 = vsub.f32 1.0, %v1593_v51 }
 0x48b   :  { %v504_v4 = vadd.f32 %v502_v2, %v1935_v27 }
 0x48c   :  { %1596 = vtanh.f32 %v475_v1 }
 0x48d   :  { %1598 = vtanh.f32 %v504_v4 }
 0x496   :  { %v1597_v10 = vpop.eup %1596 }
 0x497   :  { %v1599_v11 = vpop.eup %1598  ;;  %479 = vrot.lane.b32.xlu1 %v1597_v10, %s1699_s1 }
 0x498   :  { %508 = vrot.lane.b32.xlu0 %v1599_v11, %s1699_s1  ;;  %v665_v11 = vsel %vm664_vm10, 1, %v1697_v61 }
 0x49a   :  { %v1995_v16 = vpop.permute.xlu0 %517 }
 0x49b   :  { %524 = vperm.xlu1 %1575, %v522_v14   ;;  %vm519_vm8 = vcmp.eq.s32.totalorder %v1995_v16, 1 }
 0x49e   :  { %v484_v19 = vpop.permute.xlu0 %483 }
 0x49f   :  { %v486_v23 = vmul.f32 %v1593_v51, %v484_v19 }
 0x509   :  { %v480_v21 = vpop.permute.xlu1 %479 }
 0x50a   :  { %v482_v27 = vmul.f32 %v480_v21, %v477_v57  ;;  %v509_v32 = vpop.permute.xlu0 %508 }
 0x50b   :  { %v511_v37 = vmul.f32 %v509_v32, %v506_v35 }
 0x50c   :  { %v487_v28 = vadd.f32 %v486_v23, %v482_v27 }
 0x50d   :  { %v513_v41 = vadd.f32 %v512_v40, %v511_v37 }
 0x50e   :  { %v520_v31 = vsel %vm519_vm8, %v487_v28, %v484_v19  ;;  %v672_v28 = vsel %vm671_vm11, 1, %v1697_v61 }
 0x50f   :  { %529 = vrot.lane.b32.xlu1 %v520_v31, %s1699_s1 }
 0x51a   :  { %v2001_v39 = vpop.permute.xlu1 %524 }
 0x51b   :  { %vm526_vm9 = vcmp.eq.s32.totalorder %v2001_v39, 1 }
 0x51c   :  { %v527_v42 = vsel %vm526_vm9, %v513_v41, %v1964_v36 }
 0x581   :  { %v530_v43 = vpop.permute.xlu1 %529 }
 0x582   :  { %v2009_v45 = vsel %vm52_vm0, %v530_v43, %v527_v42 }
 0x583   :  { %1414 = vmatmul.mubr.msk.f32.vlgmr.msra.gmra.mrb[16].mxu0 %vm235_vm5, %v2009_v45 }
 0x584   :  { %1507 = vmatpush1.bf16.msra.mxu0 %v1768_v13  ;;  %900 = vmatprep.mubr.f32.mxu0 %v1696_v7 }
 0x585   :  { %1509 = vmatprep.subr.bf16.mxu0 %v1780_v18 }
 0x588   :  { %1511 = vmatpush1.bf16.msra.mxu0 %v1799_v25 }
 0x589   :  { %1513 = vmatprep.subr.bf16.mxu0 %v1810_v29 }
 0x58c   :  { %1515 = vmatpush1.bf16.msra.mxu0 %v1822_v33 }
 0x58d   :  { %1517 = vmatprep.subr.bf16.mxu0 %v1826_v34 }
 0x590   :  { %1519 = vmatpush1.bf16.msra.mxu0 %v1841_v38 }
 0x591   :  { %1537 = vmatprep.subr.bf16.mxu0 %v1757_v8 }
 0x656   :  { %v602_v36 = vpop.f32.mrb[16].mxu0 }
 0x657   :  { %v603_v46 = vadd.f32 %v602_v36, %v1905_v59  ;;  %v604_v47 = vpop.f32.mrb[17].mxu0 }
 0x658   :  { %v605_v48 = vadd.f32 %v604_v47, %v1914_v3 }
 0x659   :  { %617 = vrot.lane.b32.xlu0 %v603_v46, %s1698_s3  ;;  %v609_v49 = vadd.f32 %v603_v46, %v1911_v0 }
 0x65a   :  { %646 = vrot.lane.b32.xlu1 %v605_v48, %s1698_s3  ;;  %v638_v50 = vadd.f32 %v605_v48, %v1931_v22 }
 0x65b   :  { %v1415_v51 = vmul.f32 -1.442695, %v609_v49 }
 0x65c   :  { %v1416_v52 = vmul.f32 -1.442695, %v638_v50 }
 0x65d   :  { %1600 = vpow2.f32 %v1415_v51 }
 0x65e   :  { %1602 = vpow2.f32 %v1416_v52 }
 0x667   :  { %v1601_v54 = vpop.eup %1600 }
 0x668   :  { %v1603_v55 = vpop.eup %1602  ;;  %v613_v56 = vadd.f32 1.0, %v1601_v54 }
 0x669   :  { %v642_v58 = vadd.f32 1.0, %v1603_v55 }
 0x66a   :  { %1604 = vrcp.f32 %v613_v56 }
 0x66b   :  { %1606 = vrcp.f32 %v642_v58 }
 0x674   :  { %v1605_v62 = vpop.eup %1604 }
 0x675   :  { %v1607_v1 = vpop.eup %1606 }
 0x676   :  { %v656_v43 = vsub.f32 1.0, %v1607_v1  ;;  %v662_v47 = vmul.f32 %v1607_v1, %v2009_v45 }
 0x6cb   :  { %v618_v63 = vpop.permute.xlu0 %617 }
 0x6cc   :  { %v620_v2 = vmul.f32 %v1605_v62, %v618_v63  ;;  %v647_v4 = vpop.permute.xlu1 %646 }
 0x6cd   :  { %v649_v10 = vmul.f32 %v1607_v1, %v647_v4 }
 0x6ce   :  { %622 = vrot.lane.b32.xlu0 %v620_v2, %s1698_s3 }
 0x6cf   :  { %651 = vrot.lane.b32.xlu1 %v649_v10, %s1698_s3 }
 0x6d2   :  { %667 = vperm.xlu0 %1574, %v665_v11  }
 0x6d6   :  { %633 = vrot.lane.b32.xlu0 %v2009_v45, %s1700_s14 }
 0x740   :  { %v623_v14 = vpop.permute.xlu0 %622 }
 0x741   :  { %v625_v19 = vadd.f32 %v623_v14, %v1911_v0  ;;  %v652_v57 = vpop.permute.xlu1 %651  ;;  %v627_v0 = vsub.f32 1.0, %v1605_v62 }
 0x742   :  { %v654_v21 = vadd.f32 %v652_v57, %v1931_v22 }
 0x743   :  { %1608 = vtanh.f32 %v625_v19 }
 0x744   :  { %1610 = vtanh.f32 %v654_v21 }
 0x74d   :  { %v1609_v23 = vpop.eup %1608 }
 0x74e   :  { %v1611_v27 = vpop.eup %1610  ;;  %629 = vrot.lane.b32.xlu1 %v1609_v23, %s1699_s1  ;;  %v815_v23 = vsel %vm814_vm14, 1, %v1697_v61 }
 0x74f   :  { %658 = vrot.lane.b32.xlu0 %v1611_v27, %s1699_s1 }
 0x751   :  { %v2040_v31 = vpop.permute.xlu0 %667 }
 0x752   :  { %674 = vperm.xlu1 %1575, %v672_v28   ;;  %vm669_vm12 = vcmp.eq.s32.totalorder %v2040_v31, 1 }
 0x755   :  { %v634_v32 = vpop.permute.xlu0 %633 }
 0x756   :  { %v636_v37 = vmul.f32 %v1605_v62, %v634_v32 }
 0x7c0   :  { %v630_v35 = vpop.permute.xlu1 %629 }
 0x7c1   :  { %v632_v22 = vmul.f32 %v630_v35, %v627_v0  ;;  %v659_v42 = vpop.permute.xlu0 %658 }
 0x7c2   :  { %v661_v36 = vmul.f32 %v659_v42, %v656_v43 }
 0x7c3   :  { %v637_v40 = vadd.f32 %v636_v37, %v632_v22  ;;  %v822_v22 = vsel %vm821_vm15, 1, %v1697_v61 }
 0x7c4   :  { %v663_v48 = vadd.f32 %v662_v47, %v661_v36 }
 0x7c5   :  { %v670_v41 = vsel %vm669_vm12, %v637_v40, %v634_v32 }
 0x7c6   :  { %679 = vrot.lane.b32.xlu1 %v670_v41, %s1699_s1 }
 0x7d1   :  { %v2046_v46 = vpop.permute.xlu1 %674 }
 0x7d2   :  { %vm676_vm13 = vcmp.eq.s32.totalorder %v2046_v46, 1 }
 0x7d3   :  { %v677_v49 = vsel %vm676_vm13, %v663_v48, %v2009_v45 }
 0x838   :  { %v680_v50 = vpop.permute.xlu1 %679 }
 0x839   :  { %v2054_v51 = vsel %vm52_vm0, %v680_v50, %v677_v49 }
 0x83a   :  { %1417 = vmatmul.mubr.msk.f32.vlgmr.msra.gmra.mrb[4].mxu1 %vm235_vm5, %v2054_v51 }
 0x83b   :  { %1523 = vmatpush1.bf16.msra.mxu1 %v1768_v13  ;;  %1038 = vmatprep.mubr.f32.mxu1 %v1696_v7 }
 0x83c   :  { %1525 = vmatprep.subr.bf16.mxu1 %v1780_v18 }
 0x83f   :  { %1527 = vmatpush1.bf16.msra.mxu1 %v1799_v25 }
 0x840   :  { %1529 = vmatprep.subr.bf16.mxu1 %v1810_v29 }
 0x843   :  { %1531 = vmatpush1.bf16.msra.mxu1 %v1822_v33 }
 0x844   :  { %1533 = vmatprep.subr.bf16.mxu1 %v1826_v34 }
 0x847   :  { %1535 = vmatpush1.bf16.msra.mxu1 %v1841_v38 }
 0x848   :  { %1553 = vmatprep.subr.bf16.mxu1 %v1757_v8 }
 0x90d   :  { %v752_v45 = vpop.f32.mrb[4].mxu1 }
 0x90e   :  { %v753_v52 = vadd.f32 %v752_v45, %v1905_v59  ;;  %v754_v54 = vpop.f32.mrb[5].mxu1 }
 0x90f   :  { %v755_v55 = vadd.f32 %v754_v54, %v1914_v3 }
 0x910   :  { %767 = vrot.lane.b32.xlu0 %v753_v52, %s1698_s3  ;;  %v759_v56 = vadd.f32 %v753_v52, %v1919_v9 }
 0x911   :  { %796 = vrot.lane.b32.xlu1 %v755_v55, %s1698_s3  ;;  %v788_v58 = vadd.f32 %v755_v55, %v1927_v17 }
 0x912   :  { %v1418_v62 = vmul.f32 -1.442695, %v759_v56 }
 0x913   :  { %v1419_v63 = vmul.f32 -1.442695, %v788_v58 }
 0x914   :  { %1612 = vpow2.f32 %v1418_v62 }
 0x915   :  { %1614 = vpow2.f32 %v1419_v63 }
 0x91e   :  { %v1613_v1 = vpop.eup %1612 }
 0x91f   :  { %v1615_v8 = vpop.eup %1614  ;;  %v763_v2 = vadd.f32 1.0, %v1613_v1 }
 0x920   :  { %v792_v4 = vadd.f32 1.0, %v1615_v8 }
 0x921   :  { %1616 = vrcp.f32 %v763_v2 }
 0x922   :  { %1618 = vrcp.f32 %v792_v4 }
 0x92b   :  { %v1617_v10 = vpop.eup %1616 }
 0x92c   :  { %v1619_v14 = vpop.eup %1618 }
 0x92d   :  { %v806_v48 = vsub.f32 1.0, %v1619_v14  ;;  %v812_v50 = vmul.f32 %v1619_v14, %v2054_v51 }
 0x982   :  { %v768_v11 = vpop.permute.xlu0 %767 }
 0x983   :  { %v770_v19 = vmul.f32 %v1617_v10, %v768_v11  ;;  %v797_v57 = vpop.permute.xlu1 %796 }
 0x984   :  { %v799_v21 = vmul.f32 %v1619_v14, %v797_v57 }
 0x985   :  { %772 = vrot.lane.b32.xlu0 %v770_v19, %s1698_s3 }
 0x986   :  { %801 = vrot.lane.b32.xlu1 %v799_v21, %s1698_s3 }
 0x989   :  { %817 = vperm.xlu0 %1574, %v815_v23  }
 0x98d   :  { %783 = vrot.lane.b32.xlu0 %v2054_v51, %s1700_s14 }
 0x9f7   :  { %v773_v27 = vpop.permute.xlu0 %772 }
 0x9f8   :  { %v775_v28 = vadd.f32 %v773_v27, %v1919_v9  ;;  %v802_v32 = vpop.permute.xlu1 %801  ;;  %v777_v9 = vsub.f32 1.0, %v1617_v10 }
 0x9f9   :  { %v804_v0 = vadd.f32 %v802_v32, %v1927_v17 }
 0x9fa   :  { %1620 = vtanh.f32 %v775_v28 }
 0x9fb   :  { %1622 = vtanh.f32 %v804_v0 }
 0xa04   :  { %v1621_v35 = vpop.eup %1620 }
 0xa05   :  { %v1623_v37 = vpop.eup %1622  ;;  %779 = vrot.lane.b32.xlu1 %v1621_v35, %s1699_s1 }
 0xa06   :  { %808 = vrot.lane.b32.xlu0 %v1623_v37, %s1699_s1 }
 0xa08   :  { %v2085_v40 = vpop.permute.xlu0 %817 }
 0xa09   :  { %824 = vperm.xlu1 %1575, %v822_v22   ;;  %vm819_vm1 = vcmp.eq.s32.totalorder %v2085_v40, 1 }
 0xa0c   :  { %v784_v41 = vpop.permute.xlu0 %783 }
 0xa0d   :  { %v786_v43 = vmul.f32 %v1617_v10, %v784_v41 }
 0xa77   :  { %v780_v42 = vpop.permute.xlu1 %779 }
 0xa78   :  { %v782_v17 = vmul.f32 %v780_v42, %v777_v9  ;;  %v809_v47 = vpop.permute.xlu0 %808 }
 0xa79   :  { %v811_v49 = vmul.f32 %v809_v47, %v806_v48 }
 0xa7a   :  { %v787_v36 = vadd.f32 %v786_v43, %v782_v17 }
 0xa7b   :  { %v813_v45 = vadd.f32 %v812_v50, %v811_v49 }
 0xa7c   :  { %v820_v44 = vsel %vm819_vm1, %v787_v36, %v784_v41 }
 0xa7d   :  { %829 = vrot.lane.b32.xlu1 %v820_v44, %s1699_s1 }
 0xa88   :  { %v825_v61 = vpop.permute.xlu1 %824 }
 0xa89   :  { %vm826_vm2 = vcmp.eq.s32.totalorder %v825_v61, 1 }
 0xa8a   :  { %v827_v52 = vsel %vm826_vm2, %v813_v45, %v2054_v51 }
 0xaef   :  { %v830_v54 = vpop.permute.xlu1 %829 }
 0xaf0   :  { %v832_v55 = vsel %vm52_vm0, %v830_v54, %v827_v52 }
 0xaf1   :  { %1420 = vmatmul.mubr.msk.f32.vlgmr.msra.gmra.mrb[18].mxu0 %vm235_vm5, %v832_v55 }
 0xaf2   :  { %1539 = vmatpush1.bf16.msra.mxu0 %v1768_v13  ;;  %1176 = vmatprep.mubr.f32.mxu0 %v1696_v7 }
 0xaf3   :  { %1541 = vmatprep.subr.bf16.mxu0 %v1780_v18 }
 0xaf6   :  { %1543 = vmatpush1.bf16.msra.mxu0 %v1799_v25 }
 0xaf7   :  { %1545 = vmatprep.subr.bf16.mxu0 %v1810_v29 }
 0xafa   :  { %1547 = vmatpush1.bf16.msra.mxu0 %v1822_v33 }
 0xafb   :  { %1549 = vmatprep.subr.bf16.mxu0 %v1826_v34 }
 0xafe   :  { %1551 = vmatpush1.bf16.msra.mxu0 %v1841_v38 }
 0xbc4   :  { %v902_v51 = vpop.f32.mrb[18].mxu0 }
 0xbc5   :  { %v903_v56 = vadd.f32 %v902_v51, %v1905_v59  ;;  %v904_v58 = vpop.f32.mrb[19].mxu0 }
 0xbc6   :  { %v905_v62 = vadd.f32 %v904_v58, %v1914_v3 }
 0xbc7   :  { %917 = vrot.lane.b32.xlu0 %v903_v56, %s1698_s3  ;;  %v909_v63 = vadd.f32 %v903_v56, %v1925_v15 }
 0xbc8   :  { %946 = vrot.lane.b32.xlu1 %v905_v62, %s1698_s3  ;;  %v938_v1 = vadd.f32 %v905_v62, %v1922_v12 }
 0xbc9   :  { %v1421_v8 = vmul.f32 -1.442695, %v909_v63 }
 0xbca   :  { %v1422_v2 = vmul.f32 -1.442695, %v938_v1 }
 0xbcb   :  { %1624 = vpow2.f32 %v1421_v8 }
 0xbcc   :  { %1626 = vpow2.f32 %v1422_v2 }
 0xbd5   :  { %v1625_v4 = vpop.eup %1624 }
 0xbd6   :  { %v1627_v10 = vpop.eup %1626  ;;  %v913_v11 = vadd.f32 1.0, %v1625_v4 }
 0xbd7   :  { %v942_v14 = vadd.f32 1.0, %v1627_v10 }
 0xbd8   :  { %1628 = vrcp.f32 %v913_v11 }
 0xbd9   :  { %1630 = vrcp.f32 %v942_v14 }
 0xbe2   :  { %v1629_v19 = vpop.eup %1628 }
 0xbe3   :  { %v1631_v21 = vpop.eup %1630  ;;  %v927_v42 = vsub.f32 1.0, %v1629_v19 }
 0xbe4   :  { %v956_v48 = vsub.f32 1.0, %v1631_v21  ;;  %v962_v49 = vmul.f32 %v1631_v21, %v832_v55 }
 0xc39   :  { %v918_v57 = vpop.permute.xlu0 %917 }
 0xc3a   :  { %v920_v23 = vmul.f32 %v1629_v19, %v918_v57  ;;  %v947_v27 = vpop.permute.xlu1 %946 }
 0xc3b   :  { %v949_v28 = vmul.f32 %v1631_v21, %v947_v27 }
 0xc3c   :  { %922 = vrot.lane.b32.xlu0 %v920_v23, %s1698_s3 }
 0xc3d   :  { %951 = vrot.lane.b32.xlu1 %v949_v28, %s1698_s3 }
 0xc41   :  { %933 = vrot.lane.b32.xlu1 %v832_v55, %s1700_s14 }
 0xcae   :  { %v923_v32 = vpop.permute.xlu0 %922 }
 0xcaf   :  { %v925_v0 = vadd.f32 %v923_v32, %v1925_v15  ;;  %v952_v35 = vpop.permute.xlu1 %951 }
 0xcb0   :  { %v954_v37 = vadd.f32 %v952_v35, %v1922_v12 }
 0xcb1   :  { %1632 = vtanh.f32 %v925_v0 }
 0xcb2   :  { %1634 = vtanh.f32 %v954_v37 }
 0xcb3   :  { %v934_v9 = vpop.permute.xlu1 %933 }
 0xcb4   :  { %v936_v17 = vmul.f32 %v1629_v19, %v934_v9 }
 0xcbb   :  { %v1633_v22 = vpop.eup %1632 }
 0xcbc   :  { %929 = vrot.lane.b32.xlu0 %v1633_v22, %s1699_s1  ;;  %v1635_v41 = vpop.eup %1634 }
 0xcc0   :  { %958 = vrot.lane.b32.xlu0 %v1635_v41, %s1699_s1 }
 0xd2e   :  { %v930_v43 = vpop.permute.xlu0 %929 }
 0xd2f   :  { %v932_v36 = vmul.f32 %v930_v43, %v927_v42 }
 0xd31   :  { %v937_v44 = vadd.f32 %v936_v17, %v932_v36 }
 0xd32   :  { %v959_v15 = vpop.permute.xlu0 %958 }
 0xd33   :  { %v964_v47 = vsel %vm826_vm2, %v937_v44, %v934_v9  ;;  %v961_v12 = vmul.f32 %v959_v15, %v956_v48 }
 0xd34   :  { %967 = vrot.lane.b32.xlu1 %v964_v47, %s1699_s1 }
 0xd35   :  { %v963_v50 = vadd.f32 %v962_v49, %v961_v12 }
 0xd37   :  { %v965_v52 = vsel %vm819_vm1, %v963_v50, %v832_v55 }
 0xda6   :  { %v968_v45 = vpop.permute.xlu1 %967 }
 0xda7   :  { %v970_v54 = vsel %vm52_vm0, %v968_v45, %v965_v52 }
 0xda8   :  { %1423 = vmatmul.mubr.msk.f32.vlgmr.msra.gmra.mrb[6].mxu1 %vm235_vm5, %v970_v54 }
 0xda9   :  { %1555 = vmatpush1.bf16.msra.mxu1 %v1768_v13  ;;  %1314 = vmatprep.mubr.f32.mxu1 %v1696_v7 }
 0xdaa   :  { %1557 = vmatprep.subr.bf16.mxu1 %v1780_v18 }
 0xdad   :  { %1559 = vmatpush1.bf16.msra.mxu1 %v1799_v25 }
 0xdae   :  { %1561 = vmatprep.subr.bf16.mxu1 %v1810_v29 }
 0xdb1   :  { %1563 = vmatpush1.bf16.msra.mxu1 %v1822_v33 }
 0xdb2   :  { %1565 = vmatprep.subr.bf16.mxu1 %v1826_v34 }
 0xdb5   :  { %1567 = vmatpush1.bf16.msra.mxu1 %v1841_v38 }
 0xe7b   :  { %v1040_v40 = vpop.f32.mrb[6].mxu1 }
 0xe7c   :  { %v1041_v61 = vadd.f32 %v1040_v40, %v1905_v59  ;;  %v1042_v55 = vpop.f32.mrb[7].mxu1 }
 0xe7d   :  { %v1043_v13 = vadd.f32 %v1042_v55, %v1914_v3 }
 0xe7e   :  { %1055 = vrot.lane.b32.xlu0 %v1041_v61, %s1698_s3  ;;  %v1047_v7 = vadd.f32 %v1041_v61, %v1929_v20 }
 0xe7f   :  { %1084 = vrot.lane.b32.xlu1 %v1043_v13, %s1698_s3  ;;  %v1076_v18 = vadd.f32 %v1043_v13, %v1916_v5 }
 0xe80   :  { %v1424_v25 = vmul.f32 -1.442695, %v1047_v7 }
 0xe81   :  { %v1425_v29 = vmul.f32 -1.442695, %v1076_v18 }
 0xe82   :  { %1636 = vpow2.f32 %v1424_v25 }
 0xe83   :  { %1638 = vpow2.f32 %v1425_v29 }
 0xe8c   :  { %v1637_v33 = vpop.eup %1636 }
 0xe8d   :  { %v1639_v34 = vpop.eup %1638  ;;  %v1051_v38 = vadd.f32 1.0, %v1637_v33 }
 0xe8e   :  { %v1080_v51 = vadd.f32 1.0, %v1639_v34 }
 0xe8f   :  { %1640 = vrcp.f32 %v1051_v38 }
 0xe90   :  { %1642 = vrcp.f32 %v1080_v51 }
 0xe99   :  { %v1641_v56 = vpop.eup %1640 }
 0xe9a   :  { %v1643_v62 = vpop.eup %1642  ;;  %v1065_v21 = vsub.f32 1.0, %v1641_v56 }
 0xe9b   :  { %v1100_v37 = vmul.f32 %v1643_v62, %v970_v54 }
 0xef0   :  { %v1056_v58 = vpop.permute.xlu0 %1055 }
 0xef1   :  { %v1058_v63 = vmul.f32 %v1641_v56, %v1056_v58  ;;  %v1085_v1 = vpop.permute.xlu1 %1084 }
 0xef2   :  { %v1087_v8 = vmul.f32 %v1643_v62, %v1085_v1 }
 0xef3   :  { %1060 = vrot.lane.b32.xlu0 %v1058_v63, %s1698_s3 }
 0xef4   :  { %1089 = vrot.lane.b32.xlu1 %v1087_v8, %s1698_s3 }
 0xef8   :  { %1071 = vrot.lane.b32.xlu1 %v970_v54, %s1700_s14 }
 0xf65   :  { %v1061_v2 = vpop.permute.xlu0 %1060 }
 0xf66   :  { %v1063_v4 = vadd.f32 %v1061_v2, %v1929_v20  ;;  %v1090_v10 = vpop.permute.xlu1 %1089 }
 0xf67   :  { %v1092_v11 = vadd.f32 %v1090_v10, %v1916_v5  ;;  %v1094_v5 = vsub.f32 1.0, %v1643_v62 }
 0xf68   :  { %1644 = vtanh.f32 %v1063_v4 }
 0xf69   :  { %1646 = vtanh.f32 %v1092_v11 }
 0xf6a   :  { %v1072_v57 = vpop.permute.xlu1 %1071 }
 0xf6b   :  { %v1074_v27 = vmul.f32 %v1641_v56, %v1072_v57 }
 0xf72   :  { %v1645_v14 = vpop.eup %1644 }
 0xf73   :  { %1067 = vrot.lane.b32.xlu0 %v1645_v14, %s1699_s1  ;;  %v1647_v19 = vpop.eup %1646 }
 0xf77   :  { %1096 = vrot.lane.b32.xlu0 %v1647_v19, %s1699_s1 }
 0xfe5   :  { %v1068_v23 = vpop.permute.xlu0 %1067 }
 0xfe6   :  { %v1070_v28 = vmul.f32 %v1068_v23, %v1065_v21 }
 0xfe8   :  { %v1075_v32 = vadd.f32 %v1074_v27, %v1070_v28 }
 0xfe9   :  { %v1097_v0 = vpop.permute.xlu0 %1096 }
 0xfea   :  { %v1102_v20 = vsel %vm676_vm13, %v1075_v32, %v1072_v57  ;;  %v1099_v35 = vmul.f32 %v1097_v0, %v1094_v5 }
 0xfeb   :  { %1105 = vrot.lane.b32.xlu1 %v1102_v20, %s1699_s1 }
 0xfec   :  { %v1101_v22 = vadd.f32 %v1100_v37, %v1099_v35 }
 0xfee   :  { %v1103_v9 = vsel %vm669_vm12, %v1101_v22, %v970_v54 }
0x105d   :  { %v1106_v41 = vpop.permute.xlu1 %1105 }
0x105e   :  { %v1108_v42 = vsel %vm52_vm0, %v1106_v41, %v1103_v9 }
0x105f   :  { %1426 = vmatmul.mubr.msk.f32.vlgmr.msra.gmra.mrb[20].mxu0 %vm235_vm5, %v1108_v42 }
0x1132   :  { %v1178_v43 = vpop.f32.mrb[20].mxu0 }
0x1133   :  { %v1179_v17 = vadd.f32 %v1178_v43, %v1905_v59  ;;  %v1180_v46 = vpop.f32.mrb[21].mxu0 }
0x1134   :  { %v1181_v36 = vadd.f32 %v1180_v46, %v1914_v3 }
0x1135   :  { %1193 = vrot.lane.b32.xlu0 %v1179_v17, %s1698_s3  ;;  %v1185_v44 = vadd.f32 %v1179_v17, %v1933_v24 }
0x1136   :  { %1222 = vrot.lane.b32.xlu1 %v1181_v36, %s1698_s3  ;;  %v1214_v47 = vadd.f32 %v1181_v36, %v1907_v60 }
0x1137   :  { %v1427_v31 = vmul.f32 -1.442695, %v1185_v44 }
0x1138   :  { %v1428_v15 = vmul.f32 -1.442695, %v1214_v47 }
0x1139   :  { %1648 = vpow2.f32 %v1427_v31 }
0x113a   :  { %1650 = vpow2.f32 %v1428_v15 }
0x1143   :  { %v1649_v48 = vpop.eup %1648 }
0x1144   :  { %v1651_v12 = vpop.eup %1650  ;;  %v1189_v49 = vadd.f32 1.0, %v1649_v48 }
0x1145   :  { %v1218_v50 = vadd.f32 1.0, %v1651_v12 }
0x1146   :  { %1652 = vrcp.f32 %v1189_v49 }
0x1147   :  { %1654 = vrcp.f32 %v1218_v50 }
0x1150   :  { %v1653_v45 = vpop.eup %1652 }
0x1151   :  { %v1655_v54 = vpop.eup %1654  ;;  %v1203_v38 = vsub.f32 1.0, %v1653_v45 }
0x1152   :  { %v1238_v8 = vmul.f32 %v1655_v54, %v1108_v42 }
0x11a7   :  { %v1194_v52 = vpop.permute.xlu0 %1193 }
0x11a8   :  { %v1196_v40 = vmul.f32 %v1653_v45, %v1194_v52  ;;  %v1223_v61 = vpop.permute.xlu1 %1222 }
0x11a9   :  { %v1225_v55 = vmul.f32 %v1655_v54, %v1223_v61 }
0x11aa   :  { %1198 = vrot.lane.b32.xlu0 %v1196_v40, %s1698_s3 }
0x11ab   :  { %1227 = vrot.lane.b32.xlu1 %v1225_v55, %s1698_s3 }
0x11af   :  { %1209 = vrot.lane.b32.xlu1 %v1108_v42, %s1700_s14 }
0x121c   :  { %v1199_v13 = vpop.permute.xlu0 %1198 }
0x121d   :  { %v1201_v7 = vadd.f32 %v1199_v13, %v1933_v24  ;;  %v1228_v18 = vpop.permute.xlu1 %1227 }
0x121e   :  { %v1230_v25 = vadd.f32 %v1228_v18, %v1907_v60  ;;  %v1232_v60 = vsub.f32 1.0, %v1655_v54 }
0x121f   :  { %1656 = vtanh.f32 %v1201_v7 }
0x1220   :  { %1658 = vtanh.f32 %v1230_v25 }
0x1221   :  { %v1210_v34 = vpop.permute.xlu1 %1209 }
0x1222   :  { %v1212_v56 = vmul.f32 %v1653_v45, %v1210_v34 }
0x1229   :  { %v1657_v29 = vpop.eup %1656 }
0x122a   :  { %1205 = vrot.lane.b32.xlu0 %v1657_v29, %s1699_s1  ;;  %v1659_v33 = vpop.eup %1658 }
0x122e   :  { %1234 = vrot.lane.b32.xlu0 %v1659_v33, %s1699_s1 }
0x129c   :  { %v1206_v51 = vpop.permute.xlu0 %1205 }
0x129d   :  { %v1208_v58 = vmul.f32 %v1206_v51, %v1203_v38 }
0x129f   :  { %v1213_v62 = vadd.f32 %v1212_v56, %v1208_v58 }
0x12a0   :  { %v1235_v63 = vpop.permute.xlu0 %1234 }
0x12a1   :  { %v1240_v24 = vsel %vm526_vm9, %v1213_v62, %v1210_v34  ;;  %v1237_v1 = vmul.f32 %v1235_v63, %v1232_v60 }
0x12a2   :  { %1243 = vrot.lane.b32.xlu1 %v1240_v24, %s1699_s1 }
0x12a3   :  { %v1239_v2 = vadd.f32 %v1238_v8, %v1237_v1 }
0x12a5   :  { %v1241_v10 = vsel %vm519_vm8, %v1239_v2, %v1108_v42 }
0x1314   :  { %v1244_v4 = vpop.permute.xlu1 %1243 }
0x1315   :  { %v1246_v11 = vsel %vm52_vm0, %v1244_v4, %v1241_v10 }
0x1316   :  { %1429 = vmatmul.mubr.msk.f32.vlgmr.msra.gmra.mrb[8].mxu1 %vm235_vm5, %v1246_v11 }
0x13e9   :  { %v1316_v14 = vpop.f32.mrb[8].mxu1 }
0x13ea   :  { %v1317_v19 = vadd.f32 %v1316_v14, %v1905_v59  ;;  %v1318_v39 = vpop.f32.mrb[9].mxu1 }
0x13eb   :  { %v1319_v57 = vadd.f32 %v1318_v39, %v1914_v3 }
0x13ec   :  { %1331 = vrot.lane.b32.xlu0 %v1317_v19, %s1698_s3  ;;  %v1323_v21 = vadd.f32 %v1317_v19, %v1937_v30 }
0x13ed   :  { %1360 = vrot.lane.b32.xlu1 %v1319_v57, %s1698_s3  ;;  %v1352_v23 = vadd.f32 %v1319_v57, %v1898_v53 }
0x13ee   :  { %v1430_v16 = vmul.f32 -1.442695, %v1323_v21 }
0x13ef   :  { %v1431_v27 = vmul.f32 -1.442695, %v1352_v23 }
0x13f0   :  { %1660 = vpow2.f32 %v1430_v16 }
0x13f1   :  { %1662 = vpow2.f32 %v1431_v27 }
0x13fa   :  { %v1661_v28 = vpop.eup %1660 }
0x13fb   :  { %v1663_v32 = vpop.eup %1662  ;;  %v1327_v20 = vadd.f32 1.0, %v1661_v28 }
0x13fc   :  { %v1356_v0 = vadd.f32 1.0, %v1663_v32 }
0x13fd   :  { %1664 = vrcp.f32 %v1327_v20 }
0x13fe   :  { %1666 = vrcp.f32 %v1356_v0 }
0x1407   :  { %v1665_v59 = vpop.eup %1664 }
0x1408   :  { %v1667_v5 = vpop.eup %1666  ;;  %v1341_v44 = vsub.f32 1.0, %v1665_v59 }
0x1409   :  { %v1376_v50 = vmul.f32 %v1667_v5, %v1246_v11 }
0x145e   :  { %v1332_v3 = vpop.permute.xlu0 %1331 }
0x145f   :  { %v1334_v35 = vmul.f32 %v1665_v59, %v1332_v3  ;;  %v1361_v37 = vpop.permute.xlu1 %1360 }
0x1460   :  { %v1363_v22 = vmul.f32 %v1667_v5, %v1361_v37 }
0x1461   :  { %1336 = vrot.lane.b32.xlu0 %v1334_v35, %s1698_s3 }
0x1462   :  { %1365 = vrot.lane.b32.xlu1 %v1363_v22, %s1698_s3 }
0x1466   :  { %1347 = vrot.lane.b32.xlu1 %v1246_v11, %s1700_s14 }
0x14d3   :  { %v1337_v41 = vpop.permute.xlu0 %1336 }
0x14d4   :  { %v1339_v9 = vadd.f32 %v1337_v41, %v1937_v30  ;;  %v1366_v42 = vpop.permute.xlu1 %1365 }
0x14d5   :  { %v1368_v43 = vadd.f32 %v1366_v42, %v1898_v53  ;;  %v1370_v53 = vsub.f32 1.0, %v1667_v5 }
0x14d6   :  { %1668 = vtanh.f32 %v1339_v9 }
0x14d7   :  { %1670 = vtanh.f32 %v1368_v43 }
0x14d8   :  { %v1348_v36 = vpop.permute.xlu1 %1347 }
0x14d9   :  { %v1350_v31 = vmul.f32 %v1665_v59, %v1348_v36 }
0x14e0   :  { %v1669_v17 = vpop.eup %1668 }
0x14e1   :  { %1343 = vrot.lane.b32.xlu0 %v1669_v17, %s1699_s1  ;;  %v1671_v46 = vpop.eup %1670 }
0x14e5   :  { %1372 = vrot.lane.b32.xlu0 %v1671_v46, %s1699_s1 }
0x1553   :  { %v1344_v47 = vpop.permute.xlu0 %1343 }
0x1554   :  { %v1346_v15 = vmul.f32 %v1344_v47, %v1341_v44 }
0x1556   :  { %v1351_v48 = vadd.f32 %v1350_v31, %v1346_v15 }
0x1557   :  { %v1373_v12 = vpop.permute.xlu0 %1372 }
0x1558   :  { %v1378_v30 = vsel %vm376_vm4, %v1351_v48, %v1348_v36  ;;  %v1375_v49 = vmul.f32 %v1373_v12, %v1370_v53 }
0x1559   :  { %1381 = vrot.lane.b32.xlu1 %v1378_v30, %s1699_s1 }
0x155a   :  { %v1377_v45 = vadd.f32 %v1376_v50, %v1375_v49 }
0x155c   :  { %v1379_v54 = vsel %vm369_vm3, %v1377_v45, %v1246_v11 }
0x15cb   :  { %v1382_v52 = vpop.permute.xlu1 %1381 }
0x15cc   :  { %v1384_v40 = vsel %vm52_vm0, %v1382_v52, %v1379_v54 }
0x15cd   :  { %v1385_v61 = vsel %vm235_vm5, %v1384_v40, 0.0 }
0x15ce   :  { %1386 = vst [vmem:[#allocation3] sm:$0xff] %v1385_v61 }
0x15cf   :  { %1683 = shalt.err (!%p1680_p4)
}
0x15d0   :  { %s1684_s20 = scalar_lea.hbm %s2209_s6, 128 }
0x15d1   :  { %p1685_p5 = scmp.ne.s32.totalorder %s2209_s6, %s1684_s20  ;;  %p1688_p6 = scmp.lt.u32.totalorder %s1684_s20, %s2209_s6 }
0x15d3   :  { %p1690_p7 = pnand %p1688_p6, %p1685_p5 }
0x15d5   :  { %1693 = shalt.err (!%p1690_p7)
}
0x15d6   :  { %1396 = dma.vmem_to_hbm [thread:$0]  %s1394_s16, 128, %s2209_s6, [#allocation4]  }
0x15d7   :  { %1694 = dma.done.wait [#allocation4], 128  }
0x15d8   :  { %1695 = vsyncadd [#allocation4], 4294967168 }
0x15d9   :  { %1400 = vsyncpa [#allocation4], 1 }

</bundles_post_ra>
